<compile_context>
chip_gen: v6e
topology: v6e:2x2x1
jax: 0.10.0
libtpu: 0.0.40
codegen_flags: <defaults>
</compile_context>

<pallas_src>
import functools

import jax
import jax.numpy as jnp
from jax import lax
from jax.experimental import pallas as pl
from jax.experimental.pallas import tpu as pltpu


def _cost_volume_kernel(l_ref, r_ref, o_ref, *, num_disparities, is_right, normalize):
    # l_ref, r_ref: (C, TH, W) VMEM tiles.  o_ref: (D, TH, W) VMEM tile.
    C, TH, W = l_ref.shape
    l = l_ref[...].astype(jnp.float32)
    r = r_ref[...].astype(jnp.float32)
    scale = (1.0 / C) if normalize else 1.0
    # Lane index along W, hoisted out of the disparity loop.
    lane = lax.broadcasted_iota(jnp.int32, (TH, W), 1)

    for d in range(num_disparities):  # static unroll; num_disparities is a compile-time int
        if not is_right:
            # shifted[w] = r[w - d]  (wrap-around lanes get masked to zero below)
            shifted = r if d == 0 else pltpu.roll(r, shift=d, axis=2)
            cost = jnp.sum(l * shifted, axis=0) * scale          # (TH, W)
            cost = jnp.where(lane >= d, cost, 0.0)
        else:
            # shifted[w] = l[w + d]
            shifted = l if d == 0 else pltpu.roll(l, shift=(W - d) % W, axis=2)
            cost = jnp.sum(shifted * r, axis=0) * scale
            cost = jnp.where(lane < W - d, cost, 0.0)
        o_ref[d, :, :] = cost.astype(o_ref.dtype)


def _pick_block_h(H, target=64):
    """Largest multiple of 8 that divides H and is <= target; else the full H."""
    if H % 8 != 0:
        return H
    bh = 8
    for cand in range(8, min(H, target) + 1, 8):
        if H % cand == 0:
            bh = cand
    return bh


def cost_volume(left, right, num_disparities, is_right=False, *, normalize=True,
                block_h=None):
    """Pallas TPU cross-correlation cost volume.

    left, right: (N, C, H, W) feature maps.  Returns (N, num_disparities, H, W).

    Tiling: one grid step per (batch, H-tile).  Each step loads full-width (C, TH, W)
    slabs of left/right once and produces all `num_disparities` output planes for that
    tile in-kernel (inputs are read exactly once; the W axis stays whole so the
    disparity shift never crosses a tile boundary and the last dim stays lane-dense).
    """
    assert left.shape == right.shape and left.ndim == 4, "expect (N, C, H, W) inputs"
    assert left.dtype == right.dtype
    assert num_disparities >= 1
    N, C, H, W = left.shape
    D = int(num_disparities)

    bh = block_h if block_h is not None else _pick_block_h(H)
    assert H % bh == 0
    grid = (N, H // bh)

    kernel = functools.partial(
        _cost_volume_kernel,
        num_disparities=D,
        is_right=bool(is_right),
        normalize=bool(normalize),
    )

    feat_spec = pl.BlockSpec(
        (pl.Squeezed(), C, bh, W),
        lambda n, h: (n, 0, h, 0),
    )
    out_spec = pl.BlockSpec(
        (pl.Squeezed(), D, bh, W),
        lambda n, h: (n, 0, h, 0),
    )

    return pl.pallas_call(
        kernel,
        out_shape=jax.ShapeDtypeStruct((N, D, H, W), left.dtype),
        grid=grid,
        in_specs=[feat_spec, feat_spec],
        out_specs=out_spec,
        compiler_params=pltpu.CompilerParams(
            # No accumulation across grid steps: every block is independent.
            dimension_semantics=("parallel", "parallel"),
        ),
    )(left, right)


class ExportableCostVolume:
    """Mirror of the PyTorch module's forward pass."""

    def __init__(self, num_disparities, is_right):
        self.num_disparities = num_disparities
        self.is_right = is_right

    def __call__(self, left, right):
        return cost_volume(left, right, self.num_disparities, self.is_right)


if __name__ == "__main__":
    key = jax.random.PRNGKey(0)
    k1, k2 = jax.random.split(key)

    # Small stereo feature maps: (N, C, H, W); lane-dense W.
    N, C, H, W = 2, 16, 16, 128
    num_disparities = 8

    left = jax.random.normal(k1, (N, C, H, W), dtype=jnp.float32)
    right = jax.random.normal(k2, (N, C, H, W), dtype=jnp.float32)

    module = ExportableCostVolume(num_disparities, is_right=False)
    out = module(left, right)
    out = jax.block_until_ready(out)

    # Pure-JAX reference (same semantics as the PyTorch cost_volume loop).
    ref = jnp.zeros((N, num_disparities, H, W), jnp.float32)
    for d in range(num_disparities):
        corr = jnp.mean(left[:, :, :, d:] * right[:, :, :, : W - d], axis=1)
        ref = ref.at[:, d, :, d:].set(corr)

    assert out.shape == (N, num_disparities, H, W)
    assert out.dtype == left.dtype
    assert bool(jnp.allclose(out, ref, atol=1e-5, rtol=1e-5))

    print("KERNEL_OK")
</pallas_src>

<mosaic_0001>
module attributes {stable_mosaic.version = 11 : i64} {
  func.func @_cost_volume_kernel(%arg0: i32, %arg1: i32, %arg2: memref<1x16x16x128xf32, #tpu.memory_space<vmem>>, %arg3: memref<1x16x16x128xf32, #tpu.memory_space<vmem>>, %arg4: memref<1x8x16x128xf32, #tpu.memory_space<vmem>>) attributes {dimension_semantics = [#tpu.dimension_semantics<parallel>, #tpu.dimension_semantics<parallel>], iteration_bounds = array<i64: 2, 1>, scalar_prefetch = 0 : i64, scratch_operands = 0 : i64, tpu.core_type = #tpu.core_type<tc>, window_params = [{transform_indices = @transform_0, window_bounds = array<i64: 1, 16, 16, 128>}, {transform_indices = @transform_1, window_bounds = array<i64: 1, 16, 16, 128>}, {transform_indices = @transform_2, window_bounds = array<i64: 1, 8, 16, 128>}]} {
    %c0 = arith.constant 0 : index
    %c0_0 = arith.constant 0 : index
    %c0_1 = arith.constant 0 : index
    %c0_2 = arith.constant 0 : index
    %0 = vector.load %arg2[%c0, %c0_0, %c0_1, %c0_2] : memref<1x16x16x128xf32, #tpu.memory_space<vmem>>, vector<1x16x16x128xf32>
    %1 = vector.shape_cast %0 : vector<1x16x16x128xf32> to vector<16x16x128xf32>
    %c0_3 = arith.constant 0 : index
    %c0_4 = arith.constant 0 : index
    %c0_5 = arith.constant 0 : index
    %c0_6 = arith.constant 0 : index
    %2 = vector.load %arg3[%c0_3, %c0_4, %c0_5, %c0_6] : memref<1x16x16x128xf32, #tpu.memory_space<vmem>>, vector<1x16x16x128xf32>
    %3 = vector.shape_cast %2 : vector<1x16x16x128xf32> to vector<16x16x128xf32>
    %4 = tpu.iota {dimensions = array<i32: 1>} : vector<16x128xi32>
    %5 = arith.mulf %1, %3 : vector<16x16x128xf32>
    %cst = arith.constant dense<0.000000e+00> : vector<16x128xf32>
    %6 = vector.multi_reduction <add>, %5, %cst [0] : vector<16x16x128xf32> to vector<16x128xf32>
    %cst_7 = arith.constant 6.250000e-02 : f32
    %7 = vector.broadcast %cst_7 : f32 to vector<16x128xf32>
    %8 = arith.mulf %6, %7 : vector<16x128xf32>
    %c0_i32 = arith.constant 0 : i32
    %9 = vector.broadcast %c0_i32 : i32 to vector<16x128xi32>
    %10 = arith.cmpi sge, %4, %9 : vector<16x128xi32>
    %cst_8 = arith.constant 0.000000e+00 : f32
    %11 = vector.broadcast %cst_8 : f32 to vector<16x128xf32>
    %12 = arith.select %10, %8, %11 : vector<16x128xi1>, vector<16x128xf32>
    %c0_9 = arith.constant 0 : index
    %c0_10 = arith.constant 0 : index
    %c0_11 = arith.constant 0 : index
    %c0_12 = arith.constant 0 : index
    %13 = vector.load %arg4[%c0_9, %c0_10, %c0_11, %c0_12] : memref<1x8x16x128xf32, #tpu.memory_space<vmem>>, vector<1x1x16x128xf32>
    %14 = vector.shape_cast %13 : vector<1x1x16x128xf32> to vector<16x128xf32>
    %15 = vector.shape_cast %12 : vector<16x128xf32> to vector<1x1x16x128xf32>
    tpu.vector_store %arg4[%c0_9, %c0_10, %c0_11, %c0_12], %15 {strides = array<i32>} : memref<1x8x16x128xf32, #tpu.memory_space<vmem>>, vector<1x1x16x128xf32>,
    %c1_i32 = arith.constant 1 : i32
    %16 = tpu.dynamic_rotate %3 by %c1_i32 dim 2 : vector<16x16x128xf32>, i32 -> vector<16x16x128xf32>
    %17 = arith.mulf %1, %16 : vector<16x16x128xf32>
    %cst_13 = arith.constant dense<0.000000e+00> : vector<16x128xf32>
    %18 = vector.multi_reduction <add>, %17, %cst_13 [0] : vector<16x16x128xf32> to vector<16x128xf32>
    %cst_14 = arith.constant 6.250000e-02 : f32
    %19 = vector.broadcast %cst_14 : f32 to vector<16x128xf32>
    %20 = arith.mulf %18, %19 : vector<16x128xf32>
    %c1_i32_15 = arith.constant 1 : i32
    %21 = vector.broadcast %c1_i32_15 : i32 to vector<16x128xi32>
    %22 = arith.cmpi sge, %4, %21 : vector<16x128xi32>
    %cst_16 = arith.constant 0.000000e+00 : f32
    %23 = vector.broadcast %cst_16 : f32 to vector<16x128xf32>
    %24 = arith.select %22, %20, %23 : vector<16x128xi1>, vector<16x128xf32>
    %c0_17 = arith.constant 0 : index
    %c1 = arith.constant 1 : index
    %c0_18 = arith.constant 0 : index
    %c0_19 = arith.constant 0 : index
    %25 = vector.load %arg4[%c0_17, %c1, %c0_18, %c0_19] : memref<1x8x16x128xf32, #tpu.memory_space<vmem>>, vector<1x1x16x128xf32>
    %26 = vector.shape_cast %25 : vector<1x1x16x128xf32> to vector<16x128xf32>
    %27 = vector.shape_cast %24 : vector<16x128xf32> to vector<1x1x16x128xf32>
    tpu.vector_store %arg4[%c0_17, %c1, %c0_18, %c0_19], %27 {strides = array<i32>} : memref<1x8x16x128xf32, #tpu.memory_space<vmem>>, vector<1x1x16x128xf32>,
    %c2_i32 = arith.constant 2 : i32
    %28 = tpu.dynamic_rotate %3 by %c2_i32 dim 2 : vector<16x16x128xf32>, i32 -> vector<16x16x128xf32>
    %29 = arith.mulf %1, %28 : vector<16x16x128xf32>
    %cst_20 = arith.constant dense<0.000000e+00> : vector<16x128xf32>
    %30 = vector.multi_reduction <add>, %29, %cst_20 [0] : vector<16x16x128xf32> to vector<16x128xf32>
    %cst_21 = arith.constant 6.250000e-02 : f32
    %31 = vector.broadcast %cst_21 : f32 to vector<16x128xf32>
    %32 = arith.mulf %30, %31 : vector<16x128xf32>
    %c2_i32_22 = arith.constant 2 : i32
    %33 = vector.broadcast %c2_i32_22 : i32 to vector<16x128xi32>
    %34 = arith.cmpi sge, %4, %33 : vector<16x128xi32>
    %cst_23 = arith.constant 0.000000e+00 : f32
    %35 = vector.broadcast %cst_23 : f32 to vector<16x128xf32>
    %36 = arith.select %34, %32, %35 : vector<16x128xi1>, vector<16x128xf32>
    %c0_24 = arith.constant 0 : index
    %c2 = arith.constant 2 : index
    %c0_25 = arith.constant 0 : index
    %c0_26 = arith.constant 0 : index
    %37 = vector.load %arg4[%c0_24, %c2, %c0_25, %c0_26] : memref<1x8x16x128xf32, #tpu.memory_space<vmem>>, vector<1x1x16x128xf32>
    %38 = vector.shape_cast %37 : vector<1x1x16x128xf32> to vector<16x128xf32>
    %39 = vector.shape_cast %36 : vector<16x128xf32> to vector<1x1x16x128xf32>
    tpu.vector_store %arg4[%c0_24, %c2, %c0_25, %c0_26], %39 {strides = array<i32>} : memref<1x8x16x128xf32, #tpu.memory_space<vmem>>, vector<1x1x16x128xf32>,
    %c3_i32 = arith.constant 3 : i32
    %40 = tpu.dynamic_rotate %3 by %c3_i32 dim 2 : vector<16x16x128xf32>, i32 -> vector<16x16x128xf32>
    %41 = arith.mulf %1, %40 : vector<16x16x128xf32>
    %cst_27 = arith.constant dense<0.000000e+00> : vector<16x128xf32>
    %42 = vector.multi_reduction <add>, %41, %cst_27 [0] : vector<16x16x128xf32> to vector<16x128xf32>
    %cst_28 = arith.constant 6.250000e-02 : f32
    %43 = vector.broadcast %cst_28 : f32 to vector<16x128xf32>
    %44 = arith.mulf %42, %43 : vector<16x128xf32>
    %c3_i32_29 = arith.constant 3 : i32
    %45 = vector.broadcast %c3_i32_29 : i32 to vector<16x128xi32>
    %46 = arith.cmpi sge, %4, %45 : vector<16x128xi32>
    %cst_30 = arith.constant 0.000000e+00 : f32
    %47 = vector.broadcast %cst_30 : f32 to vector<16x128xf32>
    %48 = arith.select %46, %44, %47 : vector<16x128xi1>, vector<16x128xf32>
    %c0_31 = arith.constant 0 : index
    %c3 = arith.constant 3 : index
    %c0_32 = arith.constant 0 : index
    %c0_33 = arith.constant 0 : index
    %49 = vector.load %arg4[%c0_31, %c3, %c0_32, %c0_33] : memref<1x8x16x128xf32, #tpu.memory_space<vmem>>, vector<1x1x16x128xf32>
    %50 = vector.shape_cast %49 : vector<1x1x16x128xf32> to vector<16x128xf32>
    %51 = vector.shape_cast %48 : vector<16x128xf32> to vector<1x1x16x128xf32>
    tpu.vector_store %arg4[%c0_31, %c3, %c0_32, %c0_33], %51 {strides = array<i32>} : memref<1x8x16x128xf32, #tpu.memory_space<vmem>>, vector<1x1x16x128xf32>,
    %c4_i32 = arith.constant 4 : i32
    %52 = tpu.dynamic_rotate %3 by %c4_i32 dim 2 : vector<16x16x128xf32>, i32 -> vector<16x16x128xf32>
    %53 = arith.mulf %1, %52 : vector<16x16x128xf32>
    %cst_34 = arith.constant dense<0.000000e+00> : vector<16x128xf32>
    %54 = vector.multi_reduction <add>, %53, %cst_34 [0] : vector<16x16x128xf32> to vector<16x128xf32>
    %cst_35 = arith.constant 6.250000e-02 : f32
    %55 = vector.broadcast %cst_35 : f32 to vector<16x128xf32>
    %56 = arith.mulf %54, %55 : vector<16x128xf32>
    %c4_i32_36 = arith.constant 4 : i32
    %57 = vector.broadcast %c4_i32_36 : i32 to vector<16x128xi32>
    %58 = arith.cmpi sge, %4, %57 : vector<16x128xi32>
    %cst_37 = arith.constant 0.000000e+00 : f32
    %59 = vector.broadcast %cst_37 : f32 to vector<16x128xf32>
    %60 = arith.select %58, %56, %59 : vector<16x128xi1>, vector<16x128xf32>
    %c0_38 = arith.constant 0 : index
    %c4 = arith.constant 4 : index
    %c0_39 = arith.constant 0 : index
    %c0_40 = arith.constant 0 : index
    %61 = vector.load %arg4[%c0_38, %c4, %c0_39, %c0_40] : memref<1x8x16x128xf32, #tpu.memory_space<vmem>>, vector<1x1x16x128xf32>
    %62 = vector.shape_cast %61 : vector<1x1x16x128xf32> to vector<16x128xf32>
    %63 = vector.shape_cast %60 : vector<16x128xf32> to vector<1x1x16x128xf32>
    tpu.vector_store %arg4[%c0_38, %c4, %c0_39, %c0_40], %63 {strides = array<i32>} : memref<1x8x16x128xf32, #tpu.memory_space<vmem>>, vector<1x1x16x128xf32>,
    %c5_i32 = arith.constant 5 : i32
    %64 = tpu.dynamic_rotate %3 by %c5_i32 dim 2 : vector<16x16x128xf32>, i32 -> vector<16x16x128xf32>
    %65 = arith.mulf %1, %64 : vector<16x16x128xf32>
    %cst_41 = arith.constant dense<0.000000e+00> : vector<16x128xf32>
    %66 = vector.multi_reduction <add>, %65, %cst_41 [0] : vector<16x16x128xf32> to vector<16x128xf32>
    %cst_42 = arith.constant 6.250000e-02 : f32
    %67 = vector.broadcast %cst_42 : f32 to vector<16x128xf32>
    %68 = arith.mulf %66, %67 : vector<16x128xf32>
    %c5_i32_43 = arith.constant 5 : i32
    %69 = vector.broadcast %c5_i32_43 : i32 to vector<16x128xi32>
    %70 = arith.cmpi sge, %4, %69 : vector<16x128xi32>
    %cst_44 = arith.constant 0.000000e+00 : f32
    %71 = vector.broadcast %cst_44 : f32 to vector<16x128xf32>
    %72 = arith.select %70, %68, %71 : vector<16x128xi1>, vector<16x128xf32>
    %c0_45 = arith.constant 0 : index
    %c5 = arith.constant 5 : index
    %c0_46 = arith.constant 0 : index
    %c0_47 = arith.constant 0 : index
    %73 = vector.load %arg4[%c0_45, %c5, %c0_46, %c0_47] : memref<1x8x16x128xf32, #tpu.memory_space<vmem>>, vector<1x1x16x128xf32>
    %74 = vector.shape_cast %73 : vector<1x1x16x128xf32> to vector<16x128xf32>
    %75 = vector.shape_cast %72 : vector<16x128xf32> to vector<1x1x16x128xf32>
    tpu.vector_store %arg4[%c0_45, %c5, %c0_46, %c0_47], %75 {strides = array<i32>} : memref<1x8x16x128xf32, #tpu.memory_space<vmem>>, vector<1x1x16x128xf32>,
    %c6_i32 = arith.constant 6 : i32
    %76 = tpu.dynamic_rotate %3 by %c6_i32 dim 2 : vector<16x16x128xf32>, i32 -> vector<16x16x128xf32>
    %77 = arith.mulf %1, %76 : vector<16x16x128xf32>
    %cst_48 = arith.constant dense<0.000000e+00> : vector<16x128xf32>
    %78 = vector.multi_reduction <add>, %77, %cst_48 [0] : vector<16x16x128xf32> to vector<16x128xf32>
    %cst_49 = arith.constant 6.250000e-02 : f32
    %79 = vector.broadcast %cst_49 : f32 to vector<16x128xf32>
    %80 = arith.mulf %78, %79 : vector<16x128xf32>
    %c6_i32_50 = arith.constant 6 : i32
    %81 = vector.broadcast %c6_i32_50 : i32 to vector<16x128xi32>
    %82 = arith.cmpi sge, %4, %81 : vector<16x128xi32>
    %cst_51 = arith.constant 0.000000e+00 : f32
    %83 = vector.broadcast %cst_51 : f32 to vector<16x128xf32>
    %84 = arith.select %82, %80, %83 : vector<16x128xi1>, vector<16x128xf32>
    %c0_52 = arith.constant 0 : index
    %c6 = arith.constant 6 : index
    %c0_53 = arith.constant 0 : index
    %c0_54 = arith.constant 0 : index
    %85 = vector.load %arg4[%c0_52, %c6, %c0_53, %c0_54] : memref<1x8x16x128xf32, #tpu.memory_space<vmem>>, vector<1x1x16x128xf32>
    %86 = vector.shape_cast %85 : vector<1x1x16x128xf32> to vector<16x128xf32>
    %87 = vector.shape_cast %84 : vector<16x128xf32> to vector<1x1x16x128xf32>
    tpu.vector_store %arg4[%c0_52, %c6, %c0_53, %c0_54], %87 {strides = array<i32>} : memref<1x8x16x128xf32, #tpu.memory_space<vmem>>, vector<1x1x16x128xf32>,
    %c7_i32 = arith.constant 7 : i32
    %88 = tpu.dynamic_rotate %3 by %c7_i32 dim 2 : vector<16x16x128xf32>, i32 -> vector<16x16x128xf32>
    %89 = arith.mulf %1, %88 : vector<16x16x128xf32>
    %cst_55 = arith.constant dense<0.000000e+00> : vector<16x128xf32>
    %90 = vector.multi_reduction <add>, %89, %cst_55 [0] : vector<16x16x128xf32> to vector<16x128xf32>
    %cst_56 = arith.constant 6.250000e-02 : f32
    %91 = vector.broadcast %cst_56 : f32 to vector<16x128xf32>
    %92 = arith.mulf %90, %91 : vector<16x128xf32>
    %c7_i32_57 = arith.constant 7 : i32
    %93 = vector.broadcast %c7_i32_57 : i32 to vector<16x128xi32>
    %94 = arith.cmpi sge, %4, %93 : vector<16x128xi32>
    %cst_58 = arith.constant 0.000000e+00 : f32
    %95 = vector.broadcast %cst_58 : f32 to vector<16x128xf32>
    %96 = arith.select %94, %92, %95 : vector<16x128xi1>, vector<16x128xf32>
    %c0_59 = arith.constant 0 : index
    %c7 = arith.constant 7 : index
    %c0_60 = arith.constant 0 : index
    %c0_61 = arith.constant 0 : index
    %97 = vector.load %arg4[%c0_59, %c7, %c0_60, %c0_61] : memref<1x8x16x128xf32, #tpu.memory_space<vmem>>, vector<1x1x16x128xf32>
    %98 = vector.shape_cast %97 : vector<1x1x16x128xf32> to vector<16x128xf32>
    %99 = vector.shape_cast %96 : vector<16x128xf32> to vector<1x1x16x128xf32>
    tpu.vector_store %arg4[%c0_59, %c7, %c0_60, %c0_61], %99 {strides = array<i32>} : memref<1x8x16x128xf32, #tpu.memory_space<vmem>>, vector<1x1x16x128xf32>,
    return
  }
  func.func @transform_0(%arg0: i32, %arg1: i32) -> (i32, i32, i32, i32) {
    %c0_i32 = arith.constant 0 : i32
    %c0_i32_0 = arith.constant 0 : i32
    %c0_i32_1 = arith.constant 0 : i32
    return %arg0, %c0_i32, %arg1, %c0_i32_0 : i32, i32, i32, i32
  }
  func.func @transform_1(%arg0: i32, %arg1: i32) -> (i32, i32, i32, i32) {
    %c0_i32 = arith.constant 0 : i32
    %c0_i32_0 = arith.constant 0 : i32
    %c0_i32_1 = arith.constant 0 : i32
    return %arg0, %c0_i32, %arg1, %c0_i32_0 : i32, i32, i32, i32
  }
  func.func @transform_2(%arg0: i32, %arg1: i32) -> (i32, i32, i32, i32) {
    %c0_i32 = arith.constant 0 : i32
    %c0_i32_0 = arith.constant 0 : i32
    %c0_i32_1 = arith.constant 0 : i32
    return %arg0, %c0_i32, %arg1, %c0_i32_0 : i32, i32, i32, i32
  }
}

</mosaic_0001>

<bundles_post_ra>
// kernel: tpu_custom_call.1
= control target key start
LH: loop header
LB: loop body
LE: loop exit
PB: predicated region body
PF: predicated region fallthrough
CT: control target
= control target key end

     0   :  { %7 = vsyncpa [#allocation3], 0  ;;  %s3070_s0 = inlined_call_operand.hbm [shape: f32[2,16,16,128], index: 0, kind: input, shape index: {}]   ;;  %s3071_s1 = inlined_call_operand.hbm [shape: f32[2,16,16,128], index: 1, kind: input, shape index: {}]   ;;  %s3072_s2 = inlined_call_operand.hbm [shape: f32[2,8,16,128], index: 2, kind: output, shape index: {}]  }
   0x1   :  { %9 = vsyncpa [#allocation3 + $0x1], 0 }
   0x2   :  { %10 = vsyncpa [#allocation6], 0 }
   0x3   :  { %12 = vsyncpa [#allocation6 + $0x1], 0 }
   0x4   :  { %13 = vsyncpa [#allocation4], 0 }
   0x5   :  { %15 = vsyncpa [#allocation4 + $0x1], 0  ;;  %s1778_s9 = smov 0   ;;  %s1780_s10 = smov 0  }
   0x6   :  { %s1782_s11 = smov 0   ;;  %s1784_s12 = smov 0  }
   0x7   :  { %s1786_s13 = smov 0   ;;  %s1788_s14 = smov 0  }
   0x8 LB: > { %s1429_s15 = sadd.s32 4294967295, %s1747_s14   ;;  %s1430_s16 = sadd.s32 4294967294, %s1747_s14   ;;  %s1747_s14 = sphi %s1788_s14, %s21_s14   ;;  %s1743_s13 = sphi %s1786_s13, %s3314_s13   ;;  %s1739_s12 = sphi %s1784_s12, %s3313_s12   ;;  %s1735_s11 = sphi %s1782_s11, %s3312_s11   ;;  %s1731_s10 = sphi %s1780_s10, %s3311_s10   ;;  %s1727_s9 = sphi %s1778_s9, %s3310_s9  }
   0x9   : > { %s33_s17 = sadd.s32 1, %s1743_s13  ;;  %s42_s18 = sadd.s32 1, %s1735_s11 }
   0xa   : > { %p35_p0 = scmp.ge.s32.totalorder %s33_s17, 2  ;;  %p49_p1 = scmp.ne.s32.totalorder %s1735_s11, %s1731_s10 }
   0xb   : > { %p50_p2 = scmp.eq.s32.totalorder %s1747_s14, 0  ;;  %p55_p3 = scmp.ne.s32.totalorder %s1731_s10, %s1727_s9 }
   0xc   : > { %s3316_s17 = smov (%p35_p0, %s33_s17), 0  ;;  %p56_p5 = scmp.eq.s32.totalorder %s1429_s15, 0 }
   0xd   : > { %p1819_p4 = por %p50_p2, %p49_p1  ;;  %s37_s20 = ssub.s32 %s1743_s13, %s3316_s17 }
   0xe   : > { %p109_p6 = scmp.eq.s32.totalorder %s1429_s15, 1  ;;  %p40_p7 = scmp.eq.s32.totalorder %s37_s20, 0 }
   0xf   : > { %p1825_p8 = por %p56_p5, %p55_p3  ;;  %p115_p10 = scmp.eq.s32.totalorder %s1430_s16, 1 }
  0x10   : > { %p1829_p9 = por %p109_p6, %p49_p1  ;;  %p1432_p12 = scmp.ge.s32.totalorder %s1747_s14, 2 }
  0x11   : > { %s1834_s23 = scalar_select %p40_p7, %s1735_s11, %s42_s18  }
  0x12   : > { %p1836_p11 = por %p115_p10, %p55_p3  ;;  %p1482_p13 = scmp.lt.s32.totalorder %s1747_s14, 2 }
  0x13   : > { %s1843_s25 = sand.u32 1, %s1735_s11   ;;  %s1462_s27 = sshll.u32 %s1743_s13, 12 }
  0x14   : > { %s1433_s26 = sshll.u32 %s1843_s25, 8  ;;  %s147_s30 = scalar_lea.hbm %s3070_s0, %s1462_s27 }
  0x15   : > { %s139_s3 = scalar_lea.vmem [#allocation2], %s1433_s26  ;;  %p1856_p0 = pnand %p1482_p13, %p1819_p4 }
  0x16   : > { %s148_s4 = sshll.u32 %s139_s3, 4  ;;  %p1439_p1 = scmp.ge.s32.totalorder %s1747_s14, 1  ;;  %s149_s4 = int_to_ptr.vmem [resolvable:$true] %s148_s4 }
  0x17   : > { %s136_s6 = scalar_lea.sflag [#allocation3], %s1843_s25  ;;  %p1609_p2 = pneg %p1856_p0 }
  0x18   : > { %s1620_s7 = scalar_lea.vmem %s149_s4, 4096  ;;  %s1749_s8 = smov [#allocation2]  }
  0x19   : > { %p1621_p3 = scmp.ne.s32.totalorder %s149_s4, %s1620_s7  ;;  %s1625_s15 = sshll.u32 %s1749_s8, 4  ;;  %s1626_s15 = int_to_ptr.vmem [resolvable:$false] %s1625_s15 }
  0x1a   : > { %s1627_s16 = scalar_lea.vmem %s1626_s15, 8192  ;;  %p1628_p4 = scmp.lt.s32.totalorder %s149_s4, %s1626_s15 }
  0x1b   : > { %p1623_p5 = pnand %p1621_p3, %p1609_p2  ;;  %p1629_p7 = scmp.lt.s32.totalorder %s1627_s16, %s1620_s7 }
  0x1d   : > { %p1624_p6 = pneg %p1623_p5  ;;  %p1630_p10 = por %p1629_p7, %p1628_p4 }
  0x1f   : > { %p1631_p13 = pnand %p1630_p10, %p1624_p6 }
  0x21   : > { %1634 = shalt.err (!%p1631_p13)
}
  0x22   : > { %s1750_s18 = smov 128   ;;  %s1751_s19 = smov 8  }
  0x23   : > { %1474 = dma.hbm_to_vmem [thread:$0]  (!%p1856_p0), %s147_s30, 4096, %s149_s4, %s136_s6, %s1750_s18, %s1750_s18, %s1751_s19  }
  0x24   : > { %p179_p3 = scmp.lt.s32.totalorder %s1747_s14, 3  ;;  %s170_s29 = scalar_lea.hbm %s3071_s1, %s1462_s27 }
  0x25   : > { %s162_s7 = scalar_lea.vmem [#allocation5], %s1433_s26  ;;  %s159_s15 = scalar_lea.sflag [#allocation6], %s1843_s25 }
  0x26   : > { %p1877_p5 = pnand %p1439_p1, %p179_p3  ;;  %s171_s8 = sshll.u32 %s162_s7, 4  ;;  %s172_s8 = int_to_ptr.vmem [resolvable:$true] %s171_s8 }
  0x27   : > { %s1648_s16 = scalar_lea.vmem %s172_s8, 4096  ;;  %s1752_s30 = smov [#allocation5]  }
  0x28   : > { %p1649_p6 = scmp.ne.s32.totalorder %s172_s8, %s1648_s16  ;;  %s1653_s4 = sshll.u32 %s1752_s30, 4  ;;  %s1654_s4 = int_to_ptr.vmem [resolvable:$false] %s1653_s4 }
  0x29   : > { %s1655_s27 = scalar_lea.vmem %s1654_s4, 8192  ;;  %p1656_p10 = scmp.lt.s32.totalorder %s172_s8, %s1654_s4 }
  0x2a   : > { %p1651_p4 = pnand %p1649_p6, %p1609_p2  ;;  %p1657_p1 = scmp.lt.s32.totalorder %s1655_s27, %s1648_s16 }
  0x2c   : > { %p1652_p7 = pneg %p1651_p4  ;;  %p1658_p13 = por %p1657_p1, %p1656_p10 }
  0x2e   : > { %p1659_p3 = pnand %p1658_p13, %p1652_p7 }
  0x30   : > { %1662 = shalt.err (!%p1659_p3)
}
  0x31   : > { %1477 = dma.hbm_to_vmem [thread:$0]  (!%p1856_p0), %s170_s29, 4096, %s172_s8, %s159_s15, %s1750_s18, %s1750_s18, %s1751_s19  }
  0x32   : > { %183 = sbr.rel (%p1877_p5) target bundleno = 642 (0x282), region = 28 }
  0x37   : > { %s1892_s25 = sand.u32 1, %s1731_s10  }
  0x38   : > { %s1440_s26 = sshll.u32 %s1892_s25, 8  ;;  %s186_s6 = scalar_lea.sflag [#allocation3], %s1892_s25 }
  0x39   : > { %s1896_s20 = scalar_lea.vmem [#allocation2], %s1440_s26 }
  0x3a   : > { %1714 = dma.done.wait (%p1825_p8), %s186_s6, 4096  }
  0x3b   : > { %1716 = vsyncadd (%p1825_p8), %s186_s6, 4294963200  ;;  %s195_s5 = scalar_lea.sflag [#allocation6], %s1892_s25  ;;  %s1903_s18 = scalar_lea.vmem [#allocation5], %s1440_s26 }
  0x3c   : > { %1718 = dma.done.wait (%p1825_p8), %s195_s5, 4096  }
  0x3d   : > { %1720 = vsyncadd (%p1825_p8), %s195_s5, 4294963200  ;;  %v1910_v0 = vld [vmem:[%s1903_s18 + $0x10] sm:$0xff]  ;;  %v1913_v1 = vld [vmem:[%s1903_s18] sm:$0xff]  ;;  %s1753_s19 = smov 1   ;;  %s1442_s21 = sshll.u32 %s1892_s25, 7 }
  0x3e   : > { %3171 = vst [vmem:[#allocation11_spill] sm:$0xff] %v1910_v0  ;;  %3172 = vst [vmem:[#allocation12_spill] sm:$0xff] %v1913_v1  ;;  %366 = vrot.lane.b32.xlu1 %v1910_v0, %s1753_s19  ;;  %362 = vrot.lane.b32.xlu0 %v1913_v1, %s1753_s19  ;;  %v1920_v2 = vld [vmem:[%s1903_s18 + $0x18] sm:$0xff]  ;;  %v1923_v3 = vld [vmem:[%s1903_s18 + $0x8] sm:$0xff]  ;;  %s2217_s28 = scalar_lea.vmem [#allocation7], %s1442_s21  ;;  %s1754_s29 = smov 2  }
  0x3f   : > { %3173 = vst [vmem:[#allocation13_spill] sm:$0xff] %v1920_v2  ;;  %3174 = vst [vmem:[#allocation14_spill] sm:$0xff] %v1923_v3  ;;  %v1930_v4 = vld [vmem:[%s1903_s18 + $0x28] sm:$0xff]  ;;  %v1933_v5 = vld [vmem:[%s1903_s18 + $0x20] sm:$0xff]  ;;  %s1755_s3 = smov 3   ;;  %s1756_s7 = smov 4  }
  0x40   : > { %3175 = vst [vmem:[#allocation15_spill] sm:$0xff] %v1930_v4  ;;  %3176 = vst [vmem:[#allocation16_spill] sm:$0xff] %v1933_v5  ;;  %v1940_v6 = vld [vmem:[%s1903_s18 + $0x38] sm:$0xff]  ;;  %v1943_v7 = vld [vmem:[%s1903_s18 + $0x30] sm:$0xff]  ;;  %s1757_s8 = smov 5   ;;  %s1758_s15 = smov 6  }
  0x41   : > { %3177 = vst [vmem:[#allocation17_spill] sm:$0xff] %v1940_v6  ;;  %3178 = vst [vmem:[#allocation18_spill] sm:$0xff] %v1943_v7  ;;  %v1946_v8 = vld [vmem:[%s1896_s20 + $0x10] sm:$0xff]  ;;  %v1949_v9 = vld [vmem:[%s1903_s18 + $0x48] sm:$0xff]  ;;  %s1759_s16 = smov 7   ;;  %s1464_s30 = sshll.u32 %s1739_s12, 11 }
  0x42   : > { %368 = vrot.lane.b32.xlu1 %v1920_v2, %s1753_s19  ;;  %364 = vrot.lane.b32.xlu0 %v1923_v3, %s1753_s19  ;;  %3179 = vst [vmem:[#allocation19_spill] sm:$0xff] %v1946_v8  ;;  %v295_v10 = vmul.f32 %v1910_v0, %v1946_v8  ;;  %v1954_v11 = vld [vmem:[%s1896_s20] sm:$0xff]  ;;  %v1957_v12 = vld [vmem:[%s1896_s20 + $0x18] sm:$0xff]  ;;  %s1316_s4 = sshll.u32 %s2217_s28, 4  ;;  %s3018_s6 = scalar_lea.hbm %s3072_s2, %s1464_s30  ;;  %s3020_s4 = int_to_ptr.vmem [resolvable:$true] %s1316_s4 }
  0x43   : > { %3180 = vst [vmem:[#allocation20_spill] sm:$0xff] %v1954_v11  ;;  %3181 = vst [vmem:[#allocation21_spill] sm:$0xff] %v1957_v12  ;;  %v1960_v13 = vld [vmem:[%s1896_s20 + $0x8] sm:$0xff]  ;;  %v293_v14 = vmul.f32 %v1913_v1, %v1954_v11  ;;  %v296_v15 = vmul.f32 %v1920_v2, %v1957_v12  ;;  %v1976_v18 = vld [vmem:[%s1896_s20 + $0x20] sm:$0xff]  ;;  %s1301_s12 = scalar_lea.sflag [#allocation4], %s1892_s25  ;;  %s1760_s5 = smov [#allocation7]  }
  0x44   : > { %3182 = vst [vmem:[#allocation22_spill] sm:$0xff] %v1960_v13  ;;  %v294_v16 = vmul.f32 %v1923_v3, %v1960_v13  ;;  %v1973_v17 = vld [vmem:[%s1896_s20 + $0x28] sm:$0xff]  ;;  %v1979_v19 = vld [vmem:[%s1903_s18 + $0x40] sm:$0xff]  ;;  %v297_v21 = vmul.f32 %v1933_v5, %v1976_v18  ;;  %v1986_v22 = vld [vmem:[%s1896_s20 + $0x38] sm:$0xff] }
  0x45   : > { %3183 = vst [vmem:[#allocation23_spill] sm:$0xff] %v1979_v19  ;;  %v298_v20 = vmul.f32 %v1930_v4, %v1973_v17  ;;  %v1989_v23 = vld [vmem:[%s1896_s20 + $0x30] sm:$0xff]  ;;  %v325_v24 = vadd.f32 %v295_v10, %v293_v14  ;;  %v300_v26 = vmul.f32 %v1940_v6, %v1986_v22  ;;  %v1996_v28 = vld [vmem:[%s1896_s20 + $0x48] sm:$0xff]  ;;  %v2001_v30 = vld [vmem:[%s1896_s20 + $0x40] sm:$0xff] }
  0x46   : > { %372 = vrot.lane.b32.xlu1 %v1930_v4, %s1753_s19  ;;  %370 = vrot.lane.b32.xlu0 %v1933_v5, %s1753_s19  ;;  %v340_v25 = vadd.f32 %v296_v15, %v294_v16  ;;  %v299_v27 = vmul.f32 %v1943_v7, %v1989_v23  ;;  %v302_v29 = vmul.f32 %v1949_v9, %v1996_v28  ;;  %v2008_v31 = vld [vmem:[%s1903_s18 + $0x58] sm:$0xff]  ;;  %v2013_v35 = vld [vmem:[%s1903_s18 + $0x50] sm:$0xff] }
  0x47   : > { %v326_v33 = vadd.f32 %v325_v24, %v297_v21  ;;  %v301_v34 = vmul.f32 %v1979_v19, %v2001_v30  ;;  %v2016_v36 = vld [vmem:[%s1896_s20 + $0x58] sm:$0xff]  ;;  %v2019_v37 = vld [vmem:[%s1896_s20 + $0x50] sm:$0xff]  ;;  %v2022_v38 = vld [vmem:[%s1903_s18 + $0x68] sm:$0xff] }
  0x48   : > { %v341_v32 = vadd.f32 %v340_v25, %v298_v20  ;;  %v304_v41 = vmul.f32 %v2008_v31, %v2016_v36  ;;  %v303_v42 = vmul.f32 %v2013_v35, %v2019_v37  ;;  %v2029_v43 = vld [vmem:[%s1896_s20 + $0x68] sm:$0xff]  ;;  %v2032_v44 = vld [vmem:[%s1903_s18 + $0x60] sm:$0xff]  ;;  %v2044_v47 = vld [vmem:[%s1903_s18 + $0x78] sm:$0xff] }
  0x49   : > { %v327_v40 = vadd.f32 %v326_v33, %v299_v27  ;;  %v306_v45 = vmul.f32 %v2022_v38, %v2029_v43  ;;  %v2037_v46 = vld [vmem:[%s1896_s20 + $0x60] sm:$0xff]  ;;  %v2049_v51 = vld [vmem:[%s1903_s18 + $0x70] sm:$0xff]  ;;  %v2052_v52 = vld [vmem:[%s1896_s20 + $0x78] sm:$0xff] }
  0x4a   : > { %376 = vrot.lane.b32.xlu1 %v1940_v6, %s1753_s19  ;;  %374 = vrot.lane.b32.xlu0 %v1943_v7, %s1753_s19  ;;  %v342_v39 = vadd.f32 %v341_v32, %v300_v26  ;;  %v305_v50 = vmul.f32 %v2032_v44, %v2037_v46  ;;  %v2055_v53 = vld [vmem:[%s1896_s20 + $0x70] sm:$0xff]  ;;  %v2058_v54 = vld [vmem:[%s1903_s18 + $0x88] sm:$0xff]  ;;  %v308_v57 = vmul.f32 %v2044_v47, %v2052_v52 }
  0x4b   : > { %v328_v49 = vadd.f32 %v327_v40, %v301_v34  ;;  %v307_v58 = vmul.f32 %v2049_v51, %v2055_v53  ;;  %v2065_v59 = vld [vmem:[%s1896_s20 + $0x88] sm:$0xff]  ;;  %v2068_v60 = vld [vmem:[%s1903_s18 + $0x80] sm:$0xff]  ;;  %v2082_v15 = vld [vmem:[%s1903_s18 + $0x98] sm:$0xff] }
  0x4c   : > { %v343_v48 = vadd.f32 %v342_v39, %v302_v29  ;;  %v310_v61 = vmul.f32 %v2058_v54, %v2065_v59  ;;  %v2073_v62 = vld [vmem:[%s1896_s20 + $0x80] sm:$0xff]  ;;  %v2085_v16 = vld [vmem:[%s1896_s20 + $0x98] sm:$0xff]  ;;  %v2088_v20 = vld [vmem:[%s1903_s18 + $0x90] sm:$0xff] }
  0x4d   : > { %v329_v56 = vadd.f32 %v328_v49, %v303_v42  ;;  %v309_v14 = vmul.f32 %v2068_v60, %v2073_v62  ;;  %v312_v25 = vmul.f32 %v2082_v15, %v2085_v16  ;;  %v2093_v26 = vld [vmem:[%s1896_s20 + $0x90] sm:$0xff]  ;;  %v2096_v27 = vld [vmem:[%s1903_s18 + $0xa8] sm:$0xff]  ;;  %v2110_v40 = vld [vmem:[%s1903_s18 + $0xb8] sm:$0xff] }
  0x4e   : > { %380 = vrot.lane.b32.xlu1 %v1949_v9, %s1753_s19  ;;  %378 = vrot.lane.b32.xlu0 %v1979_v19, %s1753_s19  ;;  %v344_v55 = vadd.f32 %v343_v48, %v304_v41  ;;  %v311_v29 = vmul.f32 %v2088_v20, %v2093_v26  ;;  %v2101_v32 = vld [vmem:[%s1896_s20 + $0xa8] sm:$0xff]  ;;  %3184 = vst [vmem:[#allocation24_spill] sm:$0xff] %v2110_v40  ;;  %v2113_v42 = vld [vmem:[%s1896_s20 + $0xb8] sm:$0xff] }
  0x4f   : > { %v330_v10 = vadd.f32 %v329_v56, %v305_v50  ;;  %v314_v39 = vmul.f32 %v2096_v27, %v2101_v32  ;;  %3185 = vst [vmem:[#allocation25_spill] sm:$0xff] %v2113_v42  ;;  %v2119_v48 = vld [vmem:[%s1896_s20 + $0xa0] sm:$0xff]  ;;  %v316_v49 = vmul.f32 %v2110_v40, %v2113_v42 }
  0x50   : > { %v345_v63 = vadd.f32 %v344_v55, %v306_v45  ;;  %v2116_v45 = vld [vmem:[%s1903_s18 + $0xa0] sm:$0xff] }
  0x51   : > { %v331_v24 = vadd.f32 %v330_v10, %v307_v58  ;;  %v313_v56 = vmul.f32 %v2116_v45, %v2119_v48  ;;  %v2139_v10 = vld [vmem:[%s1896_s20 + $0xb0] sm:$0xff] }
  0x52   : > { %384 = vrot.lane.b32.xlu1 %v2008_v31, %s1753_s19  ;;  %382 = vrot.lane.b32.xlu0 %v2013_v35, %s1753_s19  ;;  %v346_v21 = vadd.f32 %v345_v63, %v308_v57  ;;  %v2130_v57 = vld [vmem:[%s1903_s18 + $0xc8] sm:$0xff]  ;;  %v2136_v63 = vld [vmem:[%s1903_s18 + $0xb0] sm:$0xff]  ;;  %3189 = vst [vmem:[#allocation29_spill] sm:$0xff] %v2139_v10 }
  0x53   : > { %v332_v34 = vadd.f32 %v331_v24, %v309_v14  ;;  %3186 = vst [vmem:[#allocation26_spill] sm:$0xff] %v2130_v57  ;;  %3188 = vst [vmem:[#allocation28_spill] sm:$0xff] %v2136_v63  ;;  %v315_v24 = vmul.f32 %v2136_v63, %v2139_v10  ;;  %v2196_v10 = vld [vmem:[%s1903_s18 + $0xe0] sm:$0xff] }
  0x54   : > { %v347_v33 = vadd.f32 %v346_v21, %v310_v61  ;;  %v2133_v61 = vld [vmem:[%s1896_s20 + $0xc8] sm:$0xff]  ;;  %3200 = vst [vmem:[#allocation40_spill] sm:$0xff] %v2196_v10 }
  0x55   : > { %v333_v50 = vadd.f32 %v332_v34, %v311_v29  ;;  %3187 = vst [vmem:[#allocation27_spill] sm:$0xff] %v2133_v61  ;;  %v318_v14 = vmul.f32 %v2130_v57, %v2133_v61  ;;  %v2150_v29 = vld [vmem:[%s1903_s18 + $0xd8] sm:$0xff]  ;;  %v2156_v34 = vld [vmem:[%s1903_s18 + $0xc0] sm:$0xff] }
  0x56   : > { %388 = vrot.lane.b32.xlu1 %v2022_v38, %s1753_s19  ;;  %386 = vrot.lane.b32.xlu0 %v2032_v44, %s1753_s19  ;;  %v348_v41 = vadd.f32 %v347_v33, %v312_v25  ;;  %3190 = vst [vmem:[#allocation30_spill] sm:$0xff] %v2150_v29  ;;  %v2153_v33 = vld [vmem:[%s1896_s20 + $0xd8] sm:$0xff]  ;;  %3192 = vst [vmem:[#allocation32_spill] sm:$0xff] %v2156_v34 }
  0x57   : > { %v334_v21 = vadd.f32 %v333_v50, %v313_v56  ;;  %3191 = vst [vmem:[#allocation31_spill] sm:$0xff] %v2153_v33  ;;  %v2170_v56 = vld [vmem:[%s1903_s18 + $0xe8] sm:$0xff] }
  0x58   : > { %v349_v55 = vadd.f32 %v348_v41, %v314_v39  ;;  %v2159_v39 = vld [vmem:[%s1896_s20 + $0xc0] sm:$0xff]  ;;  %v320_v41 = vmul.f32 %v2150_v29, %v2153_v33  ;;  %3194 = vst [vmem:[#allocation34_spill] sm:$0xff] %v2170_v56  ;;  %v2179_v33 = vld [vmem:[%s1896_s20 + $0xd0] sm:$0xff] }
  0x59   : > { %3193 = vst [vmem:[#allocation33_spill] sm:$0xff] %v2159_v39  ;;  %v317_v50 = vmul.f32 %v2156_v34, %v2159_v39  ;;  %3197 = vst [vmem:[#allocation37_spill] sm:$0xff] %v2179_v33  ;;  %v2193_v39 = vld [vmem:[%s1896_s20 + $0xf8] sm:$0xff] }
  0x5a   : > { %392 = vrot.lane.b32.xlu1 %v2044_v47, %s1753_s19  ;;  %390 = vrot.lane.b32.xlu0 %v2049_v51, %s1753_s19  ;;  %v350_v58 = vadd.f32 %v349_v55, %v316_v49  ;;  %v335_v49 = vadd.f32 %v334_v21, %v315_v24  ;;  %3199 = vst [vmem:[#allocation39_spill] sm:$0xff] %v2193_v39 }
  0x5c   : > { %v351_v25 = vadd.f32 %v350_v58, %v318_v14  ;;  %v2173_v58 = vld [vmem:[%s1896_s20 + $0xe8] sm:$0xff]  ;;  %v2176_v14 = vld [vmem:[%s1903_s18 + $0xd0] sm:$0xff]  ;;  %v336_v21 = vadd.f32 %v335_v49, %v317_v50 }
  0x5d   : > { %3195 = vst [vmem:[#allocation35_spill] sm:$0xff] %v2173_v58  ;;  %3196 = vst [vmem:[#allocation36_spill] sm:$0xff] %v2176_v14  ;;  %v322_v61 = vmul.f32 %v2170_v56, %v2173_v58  ;;  %v319_v24 = vmul.f32 %v2176_v14, %v2179_v33  ;;  %v2199_v58 = vld [vmem:[%s1896_s20 + $0xe0] sm:$0xff]  ;;  %v2215_v33 = vld [vmem:[%s1903_s18 + $0xf0] sm:$0xff] }
  0x5e   : > { %396 = vrot.lane.b32.xlu1 %v2058_v54, %s1753_s19  ;;  %394 = vrot.lane.b32.xlu0 %v2068_v60, %s1753_s19  ;;  %v352_v55 = vadd.f32 %v351_v25, %v320_v41  ;;  %v2190_v41 = vld [vmem:[%s1903_s18 + $0xf8] sm:$0xff]  ;;  %3201 = vst [vmem:[#allocation41_spill] sm:$0xff] %v2199_v58  ;;  %v321_v49 = vmul.f32 %v2196_v10, %v2199_v58  ;;  %3202 = vst [vmem:[#allocation42_spill] sm:$0xff] %v2215_v33 }
  0x5f   : > { %3198 = vst [vmem:[#allocation38_spill] sm:$0xff] %v2190_v41  ;;  %v324_v42 = vmul.f32 %v2190_v41, %v2193_v39 }
  0x60   : > { %v353_v25 = vadd.f32 %v352_v55, %v322_v61  ;;  %v337_v61 = vadd.f32 %v336_v21, %v319_v24  ;;  %v2221_v21 = vld [vmem:[%s1896_s20 + $0xf0] sm:$0xff] }
  0x61   : > { %3203 = vst [vmem:[#allocation43_spill] sm:$0xff] %v2221_v21 }
  0x62   : > { %400 = vrot.lane.b32.xlu1 %v2082_v15, %s1753_s19  ;;  %398 = vrot.lane.b32.xlu0 %v2088_v20, %s1753_s19  ;;  %v354_v50 = vadd.f32 %v353_v25, %v324_v42  ;;  %v338_v39 = vadd.f32 %v337_v61, %v321_v49  ;;  %v323_v42 = vmul.f32 %v2215_v33, %v2221_v21 }
  0x64   : > { %v356_v55 = vmul.f32 0.0625, %v354_v50  ;;  %v339_v24 = vadd.f32 %v338_v39, %v323_v42 }
  0x66   : > { %404 = vrot.lane.b32.xlu1 %v2096_v27, %s1753_s19  ;;  %402 = vrot.lane.b32.xlu0 %v2116_v45, %s1753_s19  ;;  %361 = vst [vmem:[%s2217_s28 + $0x8] sm:$0xff] %v356_v55  ;;  %v355_v25 = vmul.f32 0.0625, %v339_v24 }
  0x68   : > { %360 = vst [vmem:[%s2217_s28] sm:$0xff] %v355_v25 }
  0x6a   : > { %408 = vrot.lane.b32.xlu1 %v2110_v40, %s1753_s19  ;;  %406 = vrot.lane.b32.xlu0 %v2136_v63, %s1753_s19 }
  0x6e   : > { %412 = vrot.lane.b32.xlu1 %v2130_v57, %s1753_s19  ;;  %410 = vrot.lane.b32.xlu0 %v2156_v34, %s1753_s19 }
  0x72   : > { %416 = vrot.lane.b32.xlu1 %v2150_v29, %s1753_s19  ;;  %414 = vrot.lane.b32.xlu0 %v2176_v14, %s1753_s19 }
  0x76   : > { %420 = vrot.lane.b32.xlu1 %v2170_v56, %s1753_s19  ;;  %418 = vrot.lane.b32.xlu0 %v2196_v10, %s1753_s19 }
  0x7a   : > { %424 = vrot.lane.b32.xlu1 %v2190_v41, %s1753_s19  ;;  %422 = vrot.lane.b32.xlu0 %v2215_v33, %s1753_s19 }
  0x7e   : > { %498 = vrot.lane.b32.xlu1 %v1923_v3, %s1754_s29  ;;  %496 = vrot.lane.b32.xlu0 %v1913_v1, %s1754_s29 }
  0x82   : > { %502 = vrot.lane.b32.xlu1 %v1920_v2, %s1754_s29  ;;  %500 = vrot.lane.b32.xlu0 %v1910_v0, %s1754_s29 }
  0x86   : > { %506 = vrot.lane.b32.xlu1 %v1930_v4, %s1754_s29  ;;  %504 = vrot.lane.b32.xlu0 %v1933_v5, %s1754_s29 }
  0x8a   : > { %510 = vrot.lane.b32.xlu1 %v1940_v6, %s1754_s29  ;;  %508 = vrot.lane.b32.xlu0 %v1943_v7, %s1754_s29 }
  0x8e   : > { %514 = vrot.lane.b32.xlu1 %v1949_v9, %s1754_s29  ;;  %512 = vrot.lane.b32.xlu0 %v1979_v19, %s1754_s29 }
  0x92   : > { %518 = vrot.lane.b32.xlu1 %v2008_v31, %s1754_s29  ;;  %516 = vrot.lane.b32.xlu0 %v2013_v35, %s1754_s29 }
  0x96   : > { %522 = vrot.lane.b32.xlu1 %v2022_v38, %s1754_s29  ;;  %520 = vrot.lane.b32.xlu0 %v2032_v44, %s1754_s29 }
  0x9a   : > { %526 = vrot.lane.b32.xlu1 %v2044_v47, %s1754_s29  ;;  %524 = vrot.lane.b32.xlu0 %v2049_v51, %s1754_s29 }
  0x9e   : > { %530 = vrot.lane.b32.xlu1 %v2058_v54, %s1754_s29  ;;  %528 = vrot.lane.b32.xlu0 %v2068_v60, %s1754_s29 }
  0xa2   : > { %534 = vrot.lane.b32.xlu1 %v2082_v15, %s1754_s29  ;;  %532 = vrot.lane.b32.xlu0 %v2088_v20, %s1754_s29 }
  0xa6   : > { %538 = vrot.lane.b32.xlu1 %v2096_v27, %s1754_s29  ;;  %536 = vrot.lane.b32.xlu0 %v2116_v45, %s1754_s29 }
  0xaa   : > { %542 = vrot.lane.b32.xlu1 %v2110_v40, %s1754_s29  ;;  %540 = vrot.lane.b32.xlu0 %v2136_v63, %s1754_s29 }
  0xae   : > { %546 = vrot.lane.b32.xlu1 %v2130_v57, %s1754_s29  ;;  %544 = vrot.lane.b32.xlu0 %v2156_v34, %s1754_s29 }
  0xb0   : > { %v367_v39 = vpop.permute.xlu1 %366  ;;  %v363_v61 = vpop.permute.xlu0 %362 }
  0xb2   : > { %550 = vrot.lane.b32.xlu1 %v2150_v29, %s1754_s29  ;;  %548 = vrot.lane.b32.xlu0 %v2176_v14, %s1754_s29 }
  0xb4   : > { %v369_v49 = vpop.permute.xlu1 %368  ;;  %v365_v50 = vpop.permute.xlu0 %364 }
  0xb5   : > { %v427_v29 = vmul.f32 %v365_v50, %v1960_v13 }
  0xb6   : > { %554 = vrot.lane.b32.xlu1 %v2170_v56, %s1754_s29  ;;  %552 = vrot.lane.b32.xlu0 %v2196_v10, %s1754_s29 }
  0xb8   : > { %v373_v55 = vpop.permute.xlu1 %372  ;;  %v371_v42 = vpop.permute.xlu0 %370 }
  0xb9   : > { %v430_v57 = vmul.f32 %v371_v42, %v1976_v18 }
  0xba   : > { %558 = vrot.lane.b32.xlu1 %v2190_v41, %s1754_s29  ;;  %556 = vrot.lane.b32.xlu0 %v2215_v33, %s1754_s29 }
  0xbc   : > { %v377_v24 = vpop.permute.xlu1 %376  ;;  %v375_v25 = vpop.permute.xlu0 %374 }
  0xbe   : > { %632 = vrot.lane.b32.xlu1 %v1923_v3, %s1755_s3  ;;  %630 = vrot.lane.b32.xlu0 %v1913_v1, %s1755_s3 }
  0xc0   : > { %v381_v56 = vpop.permute.xlu1 %380  ;;  %v379_v14 = vpop.permute.xlu0 %378 }
  0xc1   : > { %v434_v42 = vmul.f32 %v379_v14, %v2001_v30 }
  0xc2   : > { %636 = vrot.lane.b32.xlu1 %v1920_v2, %s1755_s3  ;;  %634 = vrot.lane.b32.xlu0 %v1910_v0, %s1755_s3  ;;  %v429_v0 = vmul.f32 %v369_v49, %v1957_v12  ;;  %v432_v49 = vmul.f32 %v375_v25, %v1989_v23 }
  0xc4   : > { %v385_v41 = vpop.permute.xlu1 %384  ;;  %v383_v10 = vpop.permute.xlu0 %382 }
  0xc6   : > { %640 = vrot.lane.b32.xlu1 %v1930_v4, %s1755_s3  ;;  %638 = vrot.lane.b32.xlu0 %v1933_v5, %s1755_s3  ;;  %v428_v4 = vmul.f32 %v367_v39, %v1946_v8  ;;  %v426_v5 = vmul.f32 %v363_v61, %v1954_v11  ;;  %v473_v39 = vadd.f32 %v429_v0, %v427_v29 }
  0xc7   : > { %v433_v61 = vmul.f32 %v377_v24, %v1986_v22  ;;  %v436_v29 = vmul.f32 %v383_v10, %v2019_v37 }
  0xc8   : > { %v389_v3 = vpop.permute.xlu1 %388  ;;  %v387_v33 = vpop.permute.xlu0 %386 }
  0xca   : > { %644 = vrot.lane.b32.xlu1 %v1940_v6, %s1755_s3  ;;  %642 = vrot.lane.b32.xlu0 %v1943_v7, %s1755_s3  ;;  %v431_v7 = vmul.f32 %v373_v55, %v1973_v17  ;;  %v435_v55 = vmul.f32 %v381_v56, %v1996_v28  ;;  %v438_v56 = vmul.f32 %v387_v33, %v2037_v46 }
  0xcc   : > { %v393_v2 = vpop.permute.xlu1 %392  ;;  %v391_v1 = vpop.permute.xlu0 %390  ;;  %v474_v13 = vadd.f32 %v473_v39, %v431_v7 }
  0xcd   : > { %v441_v14 = vmul.f32 %v393_v2, %v2052_v52  ;;  %v440_v10 = vmul.f32 %v391_v1, %v2055_v53 }
  0xce   : > { %648 = vrot.lane.b32.xlu1 %v1949_v9, %s1755_s3  ;;  %646 = vrot.lane.b32.xlu0 %v1979_v19, %s1755_s3  ;;  %v458_v19 = vadd.f32 %v428_v4, %v426_v5  ;;  %v475_v4 = vadd.f32 %v474_v13, %v433_v61  ;;  %v437_v5 = vmul.f32 %v385_v41, %v2016_v36 }
  0xd0   : > { %v397_v6 = vpop.permute.xlu1 %396  ;;  %v395_v34 = vpop.permute.xlu0 %394  ;;  %v459_v8 = vadd.f32 %v458_v19, %v430_v57  ;;  %v476_v7 = vadd.f32 %v475_v4, %v435_v55  ;;  %v439_v57 = vmul.f32 %v389_v3, %v2029_v43 }
  0xd1   : > { %v443_v3 = vmul.f32 %v397_v6, %v2065_v59  ;;  %v442_v33 = vmul.f32 %v395_v34, %v2073_v62 }
  0xd2   : > { %652 = vrot.lane.b32.xlu1 %v2008_v31, %s1755_s3  ;;  %650 = vrot.lane.b32.xlu0 %v2013_v35, %s1755_s3  ;;  %v460_v0 = vadd.f32 %v459_v8, %v432_v49  ;;  %v477_v13 = vadd.f32 %v476_v7, %v437_v5 }
  0xd4   : > { %v401_v11 = vpop.permute.xlu1 %400  ;;  %v399_v50 = vpop.permute.xlu0 %398  ;;  %v461_v19 = vadd.f32 %v460_v0, %v434_v42  ;;  %v478_v61 = vadd.f32 %v477_v13, %v439_v57  ;;  %v3204_v57 = vld [vmem:[#allocation25_spill] sm:$0xff] }
  0xd5   : > { %v445_v2 = vmul.f32 %v401_v11, %v2085_v16  ;;  %v444_v1 = vmul.f32 %v399_v50, %v2093_v26 }
  0xd6   : > { %656 = vrot.lane.b32.xlu1 %v2022_v38, %s1755_s3  ;;  %654 = vrot.lane.b32.xlu0 %v2032_v44, %s1755_s3  ;;  %v462_v8 = vadd.f32 %v461_v19, %v436_v29  ;;  %v479_v55 = vadd.f32 %v478_v61, %v441_v14  ;;  %v3206_v61 = vld [vmem:[#allocation27_spill] sm:$0xff] }
  0xd8   : > { %v405_v24 = vpop.permute.xlu1 %404  ;;  %v403_v25 = vpop.permute.xlu0 %402  ;;  %v463_v49 = vadd.f32 %v462_v8, %v438_v56  ;;  %v480_v5 = vadd.f32 %v479_v55, %v443_v3  ;;  %v3205_v56 = vld [vmem:[#allocation29_spill] sm:$0xff]  ;;  %v3208_v55 = vld [vmem:[#allocation31_spill] sm:$0xff] }
  0xd9   : > { %v447_v6 = vmul.f32 %v405_v24, %v2101_v32  ;;  %v446_v34 = vmul.f32 %v403_v25, %v2119_v48 }
  0xda   : > { %660 = vrot.lane.b32.xlu1 %v2044_v47, %s1755_s3  ;;  %658 = vrot.lane.b32.xlu0 %v2049_v51, %s1755_s3  ;;  %v464_v42 = vadd.f32 %v463_v49, %v440_v10  ;;  %v481_v7 = vadd.f32 %v480_v5, %v445_v2  ;;  %v3207_v49 = vld [vmem:[#allocation33_spill] sm:$0xff]  ;;  %v291_v5 = vlaneseq }
  0xdc   : > { %v409_v41 = vpop.permute.xlu1 %408  ;;  %v407_v39 = vpop.permute.xlu0 %406  ;;  %v465_v29 = vadd.f32 %v464_v42, %v442_v33  ;;  %v482_v14 = vadd.f32 %v481_v7, %v447_v6  ;;  %v3209_v42 = vld [vmem:[#allocation37_spill] sm:$0xff] }
  0xdd   : > { %v449_v11 = vmul.f32 %v409_v41, %v3204_v57  ;;  %v448_v50 = vmul.f32 %v407_v39, %v3205_v56 }
  0xde   : > { %664 = vrot.lane.b32.xlu1 %v2058_v54, %s1755_s3  ;;  %662 = vrot.lane.b32.xlu0 %v2068_v60, %s1755_s3  ;;  %v466_v19 = vadd.f32 %v465_v29, %v444_v1 }
  0xdf   : > { %v483_v3 = vadd.f32 %v482_v14, %v449_v11  ;;  %v2376_v11 = vand.u32 127, %v291_v5 }
  0xe0   : > { %v413_v4 = vpop.permute.xlu1 %412  ;;  %v411_v0 = vpop.permute.xlu0 %410  ;;  %v467_v10 = vadd.f32 %v466_v19, %v446_v34 }
  0xe1   : > { %v451_v24 = vmul.f32 %v413_v4, %v3206_v61  ;;  %v450_v25 = vmul.f32 %v411_v0, %v3207_v49  ;;  %v3210_v4 = vld [vmem:[#allocation35_spill] sm:$0xff]  ;;  %3211 = vst [vmem:[#allocation25_spill] sm:$0xff] %v2376_v11  ;;  %vm490_vm0 = vcmp.ge.s32.totalorder %v2376_v11, 1  ;;  %v3226_v11 = vld [vmem:[#allocation16_spill] sm:$0xff] }
  0xe2   : > { %668 = vrot.lane.b32.xlu1 %v2082_v15, %s1755_s3  ;;  %666 = vrot.lane.b32.xlu0 %v2088_v20, %s1755_s3  ;;  %v468_v33 = vadd.f32 %v467_v10, %v448_v50  ;;  %v3212_v10 = vld [vmem:[#allocation39_spill] sm:$0xff] }
  0xe3   : > { %v484_v29 = vadd.f32 %v483_v3, %v451_v24  ;;  %v3213_v3 = vld [vmem:[#allocation26_spill] sm:$0xff] }
  0xe4   : > { %v417_v13 = vpop.permute.xlu1 %416  ;;  %v415_v8 = vpop.permute.xlu0 %414  ;;  %v469_v6 = vadd.f32 %v468_v33, %v450_v25  ;;  %v3214_v33 = vld [vmem:[#allocation32_spill] sm:$0xff] }
  0xe5   : > { %v453_v41 = vmul.f32 %v417_v13, %v3208_v55  ;;  %v452_v39 = vmul.f32 %v415_v8, %v3209_v42 }
  0xe6   : > { %672 = vrot.lane.b32.xlu1 %v2096_v27, %s1755_s3  ;;  %670 = vrot.lane.b32.xlu0 %v2116_v45, %s1755_s3 }
  0xe7   : > { %v485_v7 = vadd.f32 %v484_v29, %v453_v41  ;;  %v470_v19 = vadd.f32 %v469_v6, %v452_v39  ;;  %v3215_v6 = vld [vmem:[#allocation30_spill] sm:$0xff] }
  0xe8   : > { %v421_v2 = vpop.permute.xlu1 %420  ;;  %v419_v1 = vpop.permute.xlu0 %418 }
  0xe9   : > { %v455_v34 = vmul.f32 %v421_v2, %v3210_v4  ;;  %v454_v0 = vmul.f32 %v419_v1, %v2199_v58  ;;  %v3231_v58 = vld [vmem:[#allocation22_spill] sm:$0xff] }
  0xea   : > { %676 = vrot.lane.b32.xlu1 %v2110_v40, %s1755_s3  ;;  %674 = vrot.lane.b32.xlu0 %v2136_v63, %s1755_s3 }
  0xeb   : > { %v486_v8 = vadd.f32 %v485_v7, %v455_v34  ;;  %v471_v14 = vadd.f32 %v470_v19, %v454_v0  ;;  %v3216_v34 = vld [vmem:[#allocation36_spill] sm:$0xff] }
  0xec   : > { %v425_v50 = vpop.permute.xlu1 %424  ;;  %v423_v13 = vpop.permute.xlu0 %422 }
  0xed   : > { %v457_v24 = vmul.f32 %v425_v50, %v3212_v10  ;;  %v456_v25 = vmul.f32 %v423_v13, %v2221_v21  ;;  %v3217_v13 = vld [vmem:[#allocation34_spill] sm:$0xff]  ;;  %v3230_v10 = vld [vmem:[#allocation19_spill] sm:$0xff] }
  0xee   : > { %680 = vrot.lane.b32.xlu1 %v3213_v3, %s1755_s3  ;;  %678 = vrot.lane.b32.xlu0 %v3214_v33, %s1755_s3  ;;  %v3228_v3 = vld [vmem:[#allocation18_spill] sm:$0xff] }
  0xef   : > { %v487_v41 = vadd.f32 %v486_v8, %v457_v24  ;;  %v472_v39 = vadd.f32 %v471_v14, %v456_v25  ;;  %v3218_v8 = vld [vmem:[#allocation40_spill] sm:$0xff]  ;;  %v3219_v25 = vld [vmem:[#allocation38_spill] sm:$0xff] }
  0xf0   : > { %v499_v2 = vpop.permute.xlu1 %498  ;;  %v497_v1 = vpop.permute.xlu0 %496 }
  0xf1   : > { %v489_v5 = vmul.f32 0.0625, %v487_v41  ;;  %v488_v29 = vmul.f32 0.0625, %v472_v39  ;;  %v3220_v41 = vld [vmem:[#allocation42_spill] sm:$0xff]  ;;  %v561_v4 = vmul.f32 %v499_v2, %v3231_v58 }
  0xf2   : > { %684 = vrot.lane.b32.xlu1 %v3215_v6, %s1755_s3  ;;  %682 = vrot.lane.b32.xlu0 %v3216_v34, %s1755_s3  ;;  %v3224_v34 = vld [vmem:[#allocation11_spill] sm:$0xff] }
  0xf3   : > { %v492_v0 = vsel %vm490_vm0, %v489_v5, 0.0  ;;  %v491_v7 = vsel %vm490_vm0, %v488_v29, 0.0  ;;  %v3221_v29 = vld [vmem:[#allocation14_spill] sm:$0xff] }
  0xf4   : > { %1444 = vst [vmem:[%s2217_s28 + $0x18] sm:$0xff] %v492_v0  ;;  %1443 = vst [vmem:[%s2217_s28 + $0x10] sm:$0xff] %v491_v7  ;;  %v503_v19 = vpop.permute.xlu1 %502  ;;  %v501_v50 = vpop.permute.xlu0 %500  ;;  %v3222_v0 = vld [vmem:[#allocation12_spill] sm:$0xff] }
  0xf6   : > { %688 = vrot.lane.b32.xlu1 %v3217_v13, %s1755_s3  ;;  %686 = vrot.lane.b32.xlu0 %v3218_v8, %s1755_s3  ;;  %v3223_v8 = vld [vmem:[#allocation13_spill] sm:$0xff] }
  0xf8   : > { %v507_v14 = vpop.permute.xlu1 %506  ;;  %v505_v24 = vpop.permute.xlu0 %504 }
  0xf9   : > { %v564_v55 = vmul.f32 %v505_v24, %v1976_v18 }
  0xfa   : > { %692 = vrot.lane.b32.xlu1 %v3219_v25, %s1755_s3  ;;  %690 = vrot.lane.b32.xlu0 %v3220_v41, %s1755_s3  ;;  %v3225_v41 = vld [vmem:[#allocation15_spill] sm:$0xff] }
  0xfc   : > { %v511_v39 = vpop.permute.xlu1 %510  ;;  %v509_v5 = vpop.permute.xlu0 %508 }
  0xfe   : > { %766 = vrot.lane.b32.xlu1 %v3221_v29, %s1756_s7  ;;  %764 = vrot.lane.b32.xlu0 %v3222_v0, %s1756_s7  ;;  %v3227_v0 = vld [vmem:[#allocation17_spill] sm:$0xff] }
 0x100   : > { %v515_v7 = vpop.permute.xlu1 %514  ;;  %v513_v13 = vpop.permute.xlu0 %512 }
 0x101   : > { %v568_v24 = vmul.f32 %v513_v13, %v2001_v30 }
 0x102   : > { %770 = vrot.lane.b32.xlu1 %v3223_v8, %s1756_s7  ;;  %768 = vrot.lane.b32.xlu0 %v3224_v34, %s1756_s7  ;;  %v3229_v34 = vld [vmem:[#allocation23_spill] sm:$0xff] }
 0x104   : > { %v519_v25 = vpop.permute.xlu1 %518  ;;  %v517_v6 = vpop.permute.xlu0 %516 }
 0x106   : > { %774 = vrot.lane.b32.xlu1 %v3225_v41, %s1756_s7  ;;  %772 = vrot.lane.b32.xlu0 %v3226_v11, %s1756_s7  ;;  %v563_v41 = vmul.f32 %v503_v19, %v1957_v12  ;;  %v562_v11 = vmul.f32 %v501_v50, %v3230_v10  ;;  %v567_v50 = vmul.f32 %v511_v39, %v1986_v22 }
 0x107   : > { %v566_v10 = vmul.f32 %v509_v5, %v1989_v23 }
 0x108   : > { %v523_v29 = vpop.permute.xlu1 %522  ;;  %v521_v33 = vpop.permute.xlu0 %520 }
 0x109   : > { %v572_v13 = vmul.f32 %v521_v33, %v2037_v46 }
 0x10a   : > { %778 = vrot.lane.b32.xlu1 %v3227_v0, %s1756_s7  ;;  %776 = vrot.lane.b32.xlu0 %v3228_v3, %s1756_s7  ;;  %v3232_v0 = vld [vmem:[#allocation20_spill] sm:$0xff]  ;;  %v565_v3 = vmul.f32 %v507_v14, %v1973_v17  ;;  %v569_v14 = vmul.f32 %v515_v7, %v1996_v28 }
 0x10b   : > { %v560_v42 = vmul.f32 %v497_v1, %v3232_v0 }
 0x10c   : > { %v527_v8 = vpop.permute.xlu1 %526  ;;  %v525_v21 = vpop.permute.xlu0 %524 }
 0x10d   : > { %v592_v19 = vadd.f32 %v562_v11, %v560_v42  ;;  %v571_v11 = vmul.f32 %v519_v25, %v2016_v36  ;;  %v575_v25 = vmul.f32 %v527_v8, %v2052_v52 }
 0x10e   : > { %782 = vrot.lane.b32.xlu1 %v1949_v9, %s1756_s7  ;;  %780 = vrot.lane.b32.xlu0 %v3229_v34, %s1756_s7  ;;  %v607_v34 = vadd.f32 %v563_v41, %v561_v4  ;;  %v570_v41 = vmul.f32 %v517_v6, %v2019_v37  ;;  %v574_v6 = vmul.f32 %v525_v21, %v2055_v53 }
 0x10f   : > { %v593_v1 = vadd.f32 %v592_v19, %v564_v55 }
 0x110   : > { %v531_v63 = vpop.permute.xlu1 %530  ;;  %v529_v40 = vpop.permute.xlu0 %528  ;;  %v608_v58 = vadd.f32 %v607_v34, %v565_v3  ;;  %v573_v34 = vmul.f32 %v523_v29, %v2029_v43 }
 0x111   : > { %v594_v42 = vadd.f32 %v593_v1, %v566_v10  ;;  %v577_v29 = vmul.f32 %v531_v63, %v2065_v59  ;;  %v576_v33 = vmul.f32 %v529_v40, %v2073_v62 }
 0x112   : > { %786 = vrot.lane.b32.xlu1 %v2008_v31, %s1756_s7  ;;  %784 = vrot.lane.b32.xlu0 %v2013_v35, %s1756_s7  ;;  %v609_v4 = vadd.f32 %v608_v58, %v567_v50 }
 0x113   : > { %v595_v55 = vadd.f32 %v594_v42, %v568_v24 }
 0x114   : > { %v535_v12 = vpop.permute.xlu1 %534  ;;  %v533_v2 = vpop.permute.xlu0 %532  ;;  %v610_v3 = vadd.f32 %v609_v4, %v569_v14 }
 0x115   : > { %v596_v10 = vadd.f32 %v595_v55, %v570_v41  ;;  %v579_v8 = vmul.f32 %v535_v12, %v2085_v16  ;;  %v578_v21 = vmul.f32 %v533_v2, %v2093_v26 }
 0x116   : > { %790 = vrot.lane.b32.xlu1 %v2022_v38, %s1756_s7  ;;  %788 = vrot.lane.b32.xlu0 %v2032_v44, %s1756_s7  ;;  %v611_v58 = vadd.f32 %v610_v3, %v571_v11 }
 0x117   : > { %v597_v1 = vadd.f32 %v596_v10, %v572_v13 }
 0x118   : > { %v539_v39 = vpop.permute.xlu1 %538  ;;  %v537_v5 = vpop.permute.xlu0 %536  ;;  %v612_v50 = vadd.f32 %v611_v58, %v573_v34 }
 0x119   : > { %v598_v24 = vadd.f32 %v597_v1, %v574_v6  ;;  %v581_v63 = vmul.f32 %v539_v39, %v2101_v32  ;;  %v580_v40 = vmul.f32 %v537_v5, %v2119_v48  ;;  %v3234_v1 = vld [vmem:[#allocation37_spill] sm:$0xff] }
 0x11a   : > { %794 = vrot.lane.b32.xlu1 %v2044_v47, %s1756_s7  ;;  %792 = vrot.lane.b32.xlu0 %v2049_v51, %s1756_s7  ;;  %v613_v14 = vadd.f32 %v612_v50, %v575_v25  ;;  %v3233_v50 = vld [vmem:[#allocation31_spill] sm:$0xff] }
 0x11b   : > { %v599_v41 = vadd.f32 %v598_v24, %v576_v33 }
 0x11c   : > { %v543_v7 = vpop.permute.xlu1 %542  ;;  %v541_v19 = vpop.permute.xlu0 %540  ;;  %v614_v11 = vadd.f32 %v613_v14, %v577_v29 }
 0x11d   : > { %v600_v55 = vadd.f32 %v599_v41, %v578_v21  ;;  %v583_v12 = vmul.f32 %v543_v7, %v3204_v57  ;;  %v582_v2 = vmul.f32 %v541_v19, %v3205_v56  ;;  %v3238_v41 = vld [vmem:[#allocation28_spill] sm:$0xff] }
 0x11e   : > { %798 = vrot.lane.b32.xlu1 %v2058_v54, %s1756_s7  ;;  %796 = vrot.lane.b32.xlu0 %v2068_v60, %s1756_s7  ;;  %v615_v3 = vadd.f32 %v614_v11, %v579_v8  ;;  %v3235_v8 = vld [vmem:[#allocation35_spill] sm:$0xff]  ;;  %v3237_v11 = vld [vmem:[#allocation24_spill] sm:$0xff] }
 0x11f   : > { %v601_v10 = vadd.f32 %v600_v55, %v580_v40 }
 0x120   : > { %v547_v4 = vpop.permute.xlu1 %546  ;;  %v545_v42 = vpop.permute.xlu0 %544  ;;  %v616_v58 = vadd.f32 %v615_v3, %v581_v63 }
 0x121   : > { %v585_v39 = vmul.f32 %v547_v4, %v3206_v61  ;;  %v584_v5 = vmul.f32 %v545_v42, %v3207_v49  ;;  %v602_v6 = vadd.f32 %v601_v10, %v582_v2  ;;  %v3236_v4 = vld [vmem:[#allocation41_spill] sm:$0xff] }
 0x122   : > { %802 = vrot.lane.b32.xlu1 %v2082_v15, %s1756_s7  ;;  %800 = vrot.lane.b32.xlu0 %v2088_v20, %s1756_s7  ;;  %v617_v25 = vadd.f32 %v616_v58, %v583_v12  ;;  %v3240_v58 = vld [vmem:[#allocation43_spill] sm:$0xff] }
 0x123   : > { %v603_v24 = vadd.f32 %v602_v6, %v584_v5  ;;  %v3242_v5 = vld [vmem:[#allocation32_spill] sm:$0xff] }
 0x124   : > { %v551_v34 = vpop.permute.xlu1 %550  ;;  %v549_v13 = vpop.permute.xlu0 %548  ;;  %v618_v14 = vadd.f32 %v617_v25, %v585_v39  ;;  %v3241_v39 = vld [vmem:[#allocation26_spill] sm:$0xff] }
 0x125   : > { %v587_v7 = vmul.f32 %v551_v34, %v3233_v50  ;;  %v586_v19 = vmul.f32 %v549_v13, %v3234_v1  ;;  %v3239_v34 = vld [vmem:[#allocation39_spill] sm:$0xff] }
 0x126   : > { %806 = vrot.lane.b32.xlu1 %v2096_v27, %s1756_s7  ;;  %804 = vrot.lane.b32.xlu0 %v2116_v45, %s1756_s7 }
 0x127   : > { %v619_v63 = vadd.f32 %v618_v14, %v587_v7  ;;  %v604_v40 = vadd.f32 %v603_v24, %v586_v19  ;;  %v3243_v7 = vld [vmem:[#allocation25_spill] sm:$0xff]  ;;  %v3244_v24 = vld [vmem:[#allocation30_spill] sm:$0xff] }
 0x128   : > { %v555_v29 = vpop.permute.xlu1 %554  ;;  %v553_v33 = vpop.permute.xlu0 %552  ;;  %vm624_vm1 = vcmp.ge.s32.totalorder %v3243_v7, 2  ;;  %v3255_v7 = vld [vmem:[#allocation16_spill] sm:$0xff] }
 0x129   : > { %v589_v21 = vmul.f32 %v555_v29, %v3235_v8  ;;  %v588_v42 = vmul.f32 %v553_v33, %v3236_v4  ;;  %v3261_v8 = vld [vmem:[#allocation22_spill] sm:$0xff] }
 0x12a   : > { %810 = vrot.lane.b32.xlu1 %v3237_v11, %s1756_s7  ;;  %808 = vrot.lane.b32.xlu0 %v3238_v41, %s1756_s7  ;;  %v3260_v41 = vld [vmem:[#allocation19_spill] sm:$0xff] }
 0x12b   : > { %v620_v12 = vadd.f32 %v619_v63, %v589_v21  ;;  %v605_v2 = vadd.f32 %v604_v40, %v588_v42  ;;  %v3245_v21 = vld [vmem:[#allocation36_spill] sm:$0xff] }
 0x12c   : > { %v559_v3 = vpop.permute.xlu1 %558  ;;  %v557_v55 = vpop.permute.xlu0 %556 }
 0x12d   : > { %v591_v13 = vmul.f32 %v559_v3, %v3239_v34  ;;  %v590_v10 = vmul.f32 %v557_v55, %v3240_v58  ;;  %v3246_v55 = vld [vmem:[#allocation34_spill] sm:$0xff] }
 0x12e   : > { %814 = vrot.lane.b32.xlu1 %v3241_v39, %s1756_s7  ;;  %812 = vrot.lane.b32.xlu0 %v3242_v5, %s1756_s7  ;;  %v3257_v39 = vld [vmem:[#allocation18_spill] sm:$0xff] }
 0x12f   : > { %v621_v25 = vadd.f32 %v620_v12, %v591_v13  ;;  %v606_v6 = vadd.f32 %v605_v2, %v590_v10  ;;  %v3247_v12 = vld [vmem:[#allocation40_spill] sm:$0xff]  ;;  %v3248_v10 = vld [vmem:[#allocation38_spill] sm:$0xff] }
 0x130   : > { %v633_v19 = vpop.permute.xlu1 %632  ;;  %v631_v29 = vpop.permute.xlu0 %630 }
 0x131   : > { %v623_v33 = vmul.f32 0.0625, %v621_v25  ;;  %v622_v14 = vmul.f32 0.0625, %v606_v6  ;;  %v3249_v25 = vld [vmem:[#allocation42_spill] sm:$0xff]  ;;  %v695_v1 = vmul.f32 %v633_v19, %v3261_v8 }
 0x132   : > { %818 = vrot.lane.b32.xlu1 %v3244_v24, %s1756_s7  ;;  %816 = vrot.lane.b32.xlu0 %v3245_v21, %s1756_s7  ;;  %v3253_v21 = vld [vmem:[#allocation11_spill] sm:$0xff] }
 0x133   : > { %v626_v42 = vsel %vm624_vm1, %v623_v33, 0.0  ;;  %v625_v63 = vsel %vm624_vm1, %v622_v14, 0.0  ;;  %v3250_v14 = vld [vmem:[#allocation14_spill] sm:$0xff] }
 0x134   : > { %1446 = vst [vmem:[%s2217_s28 + $0x28] sm:$0xff] %v626_v42  ;;  %1445 = vst [vmem:[%s2217_s28 + $0x20] sm:$0xff] %v625_v63  ;;  %v637_v40 = vpop.permute.xlu1 %636  ;;  %v635_v3 = vpop.permute.xlu0 %634  ;;  %v3251_v42 = vld [vmem:[#allocation12_spill] sm:$0xff] }
 0x136   : > { %822 = vrot.lane.b32.xlu1 %v3246_v55, %s1756_s7  ;;  %820 = vrot.lane.b32.xlu0 %v3247_v12, %s1756_s7  ;;  %v3252_v12 = vld [vmem:[#allocation13_spill] sm:$0xff] }
 0x138   : > { %v641_v2 = vpop.permute.xlu1 %640  ;;  %v639_v13 = vpop.permute.xlu0 %638 }
 0x139   : > { %v698_v50 = vmul.f32 %v639_v13, %v1976_v18 }
 0x13a   : > { %826 = vrot.lane.b32.xlu1 %v3248_v10, %s1756_s7  ;;  %824 = vrot.lane.b32.xlu0 %v3249_v25, %s1756_s7  ;;  %v3254_v25 = vld [vmem:[#allocation15_spill] sm:$0xff] }
 0x13c   : > { %v645_v6 = vpop.permute.xlu1 %644  ;;  %v643_v33 = vpop.permute.xlu0 %642 }
 0x13e   : > { %900 = vrot.lane.b32.xlu1 %v3250_v14, %s1757_s8  ;;  %898 = vrot.lane.b32.xlu0 %v3251_v42, %s1757_s8  ;;  %v3256_v42 = vld [vmem:[#allocation17_spill] sm:$0xff] }
 0x140   : > { %v649_v63 = vpop.permute.xlu1 %648  ;;  %v647_v55 = vpop.permute.xlu0 %646 }
 0x141   : > { %v702_v18 = vmul.f32 %v647_v55, %v2001_v30 }
 0x142   : > { %904 = vrot.lane.b32.xlu1 %v3252_v12, %s1757_s8  ;;  %902 = vrot.lane.b32.xlu0 %v3253_v21, %s1757_s8  ;;  %v3258_v21 = vld [vmem:[#allocation23_spill] sm:$0xff] }
 0x144   : > { %v653_v10 = vpop.permute.xlu1 %652  ;;  %v651_v24 = vpop.permute.xlu0 %650 }
 0x146   : > { %908 = vrot.lane.b32.xlu1 %v3254_v25, %s1757_s8  ;;  %906 = vrot.lane.b32.xlu0 %v3255_v7, %s1757_s8  ;;  %v3259_v25 = vld [vmem:[#allocation21_spill] sm:$0xff]  ;;  %v696_v7 = vmul.f32 %v635_v3, %v3260_v41  ;;  %v701_v41 = vmul.f32 %v645_v6, %v1986_v22  ;;  %v700_v3 = vmul.f32 %v643_v33, %v1989_v23 }
 0x147   : > { %v697_v34 = vmul.f32 %v637_v40, %v3259_v25  ;;  %v705_v22 = vmul.f32 %v653_v10, %v2016_v36  ;;  %v704_v23 = vmul.f32 %v651_v24, %v2019_v37 }
 0x148   : > { %v657_v14 = vpop.permute.xlu1 %656  ;;  %v655_v5 = vpop.permute.xlu0 %654 }
 0x149   : > { %v706_v30 = vmul.f32 %v655_v5, %v2037_v46 }
 0x14a   : > { %912 = vrot.lane.b32.xlu1 %v3256_v42, %s1757_s8  ;;  %910 = vrot.lane.b32.xlu0 %v3257_v39, %s1757_s8  ;;  %v694_v42 = vmul.f32 %v631_v29, %v3232_v0  ;;  %v699_v39 = vmul.f32 %v641_v2, %v1973_v17  ;;  %v703_v17 = vmul.f32 %v649_v63, %v1996_v28 }
 0x14b   : > { %v707_v28 = vmul.f32 %v657_v14, %v2029_v43  ;;  %v3262_v14 = vld [vmem:[#allocation31_spill] sm:$0xff] }
 0x14c   : > { %v661_v12 = vpop.permute.xlu1 %660  ;;  %v659_v58 = vpop.permute.xlu0 %658  ;;  %v726_v40 = vadd.f32 %v696_v7, %v694_v42 }
 0x14d   : > { %v709_v36 = vmul.f32 %v661_v12, %v2052_v52  ;;  %v708_v37 = vmul.f32 %v659_v58, %v2055_v53  ;;  %v3263_v12 = vld [vmem:[#allocation37_spill] sm:$0xff] }
 0x14e   : > { %916 = vrot.lane.b32.xlu1 %v1949_v9, %s1757_s8  ;;  %914 = vrot.lane.b32.xlu0 %v3258_v21, %s1757_s8  ;;  %v741_v9 = vadd.f32 %v697_v34, %v695_v1  ;;  %v727_v0 = vadd.f32 %v726_v40, %v698_v50  ;;  %v3265_v40 = vld [vmem:[#allocation41_spill] sm:$0xff] }
 0x150   : > { %v665_v11 = vpop.permute.xlu1 %664  ;;  %v663_v4 = vpop.permute.xlu0 %662  ;;  %v742_v19 = vadd.f32 %v741_v9, %v699_v39  ;;  %v3264_v9 = vld [vmem:[#allocation35_spill] sm:$0xff] }
 0x151   : > { %v711_v43 = vmul.f32 %v665_v11, %v2065_v59  ;;  %v710_v46 = vmul.f32 %v663_v4, %v2073_v62 }
 0x152   : > { %920 = vrot.lane.b32.xlu1 %v2008_v31, %s1757_s8  ;;  %918 = vrot.lane.b32.xlu0 %v2013_v35, %s1757_s8  ;;  %v743_v31 = vadd.f32 %v742_v19, %v701_v41  ;;  %v728_v35 = vadd.f32 %v727_v0, %v700_v3  ;;  %v3266_v41 = vld [vmem:[#allocation24_spill] sm:$0xff] }
 0x154   : > { %v669_v21 = vpop.permute.xlu1 %668  ;;  %v667_v8 = vpop.permute.xlu0 %666  ;;  %v744_v29 = vadd.f32 %v743_v31, %v703_v17  ;;  %v729_v50 = vadd.f32 %v728_v35, %v702_v18  ;;  %v3268_v17 = vld [vmem:[#allocation39_spill] sm:$0xff] }
 0x155   : > { %v713_v52 = vmul.f32 %v669_v21, %v2085_v16  ;;  %v712_v53 = vmul.f32 %v667_v8, %v2093_v26  ;;  %v3269_v31 = vld [vmem:[#allocation43_spill] sm:$0xff] }
 0x156   : > { %924 = vrot.lane.b32.xlu1 %v2022_v38, %s1757_s8  ;;  %922 = vrot.lane.b32.xlu0 %v2032_v44, %s1757_s8  ;;  %v745_v38 = vadd.f32 %v744_v29, %v705_v22  ;;  %v730_v44 = vadd.f32 %v729_v50, %v704_v23  ;;  %v3270_v22 = vld [vmem:[#allocation26_spill] sm:$0xff]  ;;  %v3271_v23 = vld [vmem:[#allocation32_spill] sm:$0xff]  ;;  %v3272_v29 = vld [vmem:[#allocation25_spill] sm:$0xff] }
 0x157   : > { %vm758_vm2 = vcmp.ge.s32.totalorder %v3272_v29, 3  ;;  %vm892_vm3 = vcmp.ge.s32.totalorder %v3272_v29, 4  ;;  %vm1026_vm4 = vcmp.ge.s32.totalorder %v3272_v29, 5 }
 0x158   : > { %v673_v1 = vpop.permute.xlu1 %672  ;;  %v671_v34 = vpop.permute.xlu0 %670  ;;  %v746_v2 = vadd.f32 %v745_v38, %v707_v28  ;;  %v731_v13 = vadd.f32 %v730_v44, %v706_v30  ;;  %v3273_v44 = vld [vmem:[#allocation30_spill] sm:$0xff] }
 0x159   : > { %v715_v59 = vmul.f32 %v673_v1, %v2101_v32  ;;  %v714_v62 = vmul.f32 %v671_v34, %v2119_v48 }
 0x15a   : > { %928 = vrot.lane.b32.xlu1 %v2044_v47, %s1757_s8  ;;  %926 = vrot.lane.b32.xlu0 %v2049_v51, %s1757_s8  ;;  %v747_v47 = vadd.f32 %v746_v2, %v709_v36  ;;  %v732_v51 = vadd.f32 %v731_v13, %v708_v37  ;;  %v3274_v36 = vld [vmem:[#allocation36_spill] sm:$0xff]  ;;  %v3275_v13 = vld [vmem:[#allocation34_spill] sm:$0xff] }
 0x15c   : > { %v677_v24 = vpop.permute.xlu1 %676  ;;  %v675_v55 = vpop.permute.xlu0 %674  ;;  %v748_v10 = vadd.f32 %v747_v47, %v711_v43  ;;  %v733_v6 = vadd.f32 %v732_v51, %v710_v46  ;;  %v3276_v43 = vld [vmem:[#allocation40_spill] sm:$0xff]  ;;  %v3277_v51 = vld [vmem:[#allocation38_spill] sm:$0xff] }
 0x15d   : > { %v717_v16 = vmul.f32 %v677_v24, %v3204_v57  ;;  %v716_v26 = vmul.f32 %v675_v55, %v3205_v56 }
 0x15e   : > { %932 = vrot.lane.b32.xlu1 %v2058_v54, %s1757_s8  ;;  %930 = vrot.lane.b32.xlu0 %v2068_v60, %s1757_s8  ;;  %v749_v54 = vadd.f32 %v748_v10, %v713_v52  ;;  %v734_v60 = vadd.f32 %v733_v6, %v712_v53  ;;  %v3278_v52 = vld [vmem:[#allocation42_spill] sm:$0xff]  ;;  %v2603_v10 = vld [vmem:[%s1903_s18] sm:$0xff] }
 0x160   : > { %v681_v58 = vpop.permute.xlu1 %680  ;;  %v679_v5 = vpop.permute.xlu0 %678  ;;  %v750_v33 = vadd.f32 %v749_v54, %v715_v59  ;;  %v735_v63 = vadd.f32 %v734_v60, %v714_v62  ;;  %v2608_v62 = vld [vmem:[%s1903_s18 + $0x18] sm:$0xff]  ;;  %v2613_v54 = vld [vmem:[%s1903_s18 + $0x10] sm:$0xff] }
 0x161   : > { %v719_v32 = vmul.f32 %v681_v58, %v3206_v61  ;;  %v718_v48 = vmul.f32 %v679_v5, %v3207_v49  ;;  %v2598_v5 = vld [vmem:[%s1903_s18 + $0x8] sm:$0xff] }
 0x162   : > { %936 = vrot.lane.b32.xlu1 %v2082_v15, %s1757_s8  ;;  %934 = vrot.lane.b32.xlu0 %v2088_v20, %s1757_s8  ;;  %v751_v15 = vadd.f32 %v750_v33, %v717_v16  ;;  %v736_v20 = vadd.f32 %v735_v63, %v716_v26  ;;  %v2618_v26 = vld [vmem:[%s1903_s18 + $0x28] sm:$0xff]  ;;  %v2628_v63 = vld [vmem:[%s1903_s18 + $0x38] sm:$0xff] }
 0x164   : > { %v685_v4 = vpop.permute.xlu1 %684  ;;  %v683_v11 = vpop.permute.xlu0 %682  ;;  %v752_v42 = vadd.f32 %v751_v15, %v719_v32  ;;  %v737_v39 = vadd.f32 %v736_v20, %v718_v48  ;;  %v2633_v32 = vld [vmem:[%s1903_s18 + $0x30] sm:$0xff]  ;;  %v2642_v20 = vld [vmem:[%s1903_s18 + $0x48] sm:$0xff] }
 0x165   : > { %v721_v57 = vmul.f32 %v685_v4, %v3262_v14  ;;  %v720_v56 = vmul.f32 %v683_v11, %v3263_v12  ;;  %v2623_v4 = vld [vmem:[%s1903_s18 + $0x20] sm:$0xff] }
 0x166   : > { %940 = vrot.lane.b32.xlu1 %v2096_v27, %s1757_s8  ;;  %938 = vrot.lane.b32.xlu0 %v2116_v45, %s1757_s8  ;;  %v3267_v27 = vld [vmem:[#allocation28_spill] sm:$0xff]  ;;  %v2647_v14 = vld [vmem:[%s1903_s18 + $0x40] sm:$0xff] }
 0x167   : > { %v753_v45 = vadd.f32 %v752_v42, %v721_v57  ;;  %v738_v3 = vadd.f32 %v737_v39, %v720_v56  ;;  %v2652_v57 = vld [vmem:[%s1896_s20 + $0x18] sm:$0xff]  ;;  %v2656_v56 = vld [vmem:[%s1896_s20 + $0x10] sm:$0xff]  ;;  %v2660_v39 = vld [vmem:[%s1896_s20 + $0x8] sm:$0xff] }
 0x168   : > { %v689_v25 = vpop.permute.xlu1 %688  ;;  %v687_v7 = vpop.permute.xlu0 %686 }
 0x169   : > { %v723_v61 = vmul.f32 %v689_v25, %v3264_v9  ;;  %v722_v49 = vmul.f32 %v687_v7, %v3265_v40 }
 0x16a   : > { %944 = vrot.lane.b32.xlu1 %v3266_v41, %s1757_s8  ;;  %942 = vrot.lane.b32.xlu0 %v3267_v27, %s1757_s8  ;;  %v2672_v27 = vld [vmem:[%s1896_s20 + $0x20] sm:$0xff] }
 0x16b   : > { %v754_v19 = vadd.f32 %v753_v45, %v723_v61  ;;  %v739_v0 = vadd.f32 %v738_v3, %v722_v49  ;;  %v2664_v61 = vld [vmem:[%s1896_s20] sm:$0xff]  ;;  %v2668_v49 = vld [vmem:[%s1896_s20 + $0x28] sm:$0xff]  ;;  %v2676_v3 = vld [vmem:[%s1903_s18 + $0x58] sm:$0xff] }
 0x16c   : > { %v693_v21 = vpop.permute.xlu1 %692  ;;  %v691_v8 = vpop.permute.xlu0 %690  ;;  %3279 = vst [vmem:[#allocation29_spill] sm:$0xff] %v2668_v49 }
 0x16d   : > { %v725_v18 = vmul.f32 %v693_v21, %v3268_v17  ;;  %v724_v35 = vmul.f32 %v691_v8, %v3269_v31  ;;  %v2681_v21 = vld [vmem:[%s1903_s18 + $0x50] sm:$0xff] }
 0x16e   : > { %948 = vrot.lane.b32.xlu1 %v3270_v22, %s1757_s8  ;;  %946 = vrot.lane.b32.xlu0 %v3271_v23, %s1757_s8 }
 0x16f   : > { %v755_v1 = vadd.f32 %v754_v19, %v725_v18  ;;  %v740_v34 = vadd.f32 %v739_v0, %v724_v35  ;;  %v2686_v0 = vld [vmem:[%s1896_s20 + $0x38] sm:$0xff]  ;;  %v2690_v18 = vld [vmem:[%s1896_s20 + $0x30] sm:$0xff] }
 0x170   : > { %v767_v50 = vpop.permute.xlu1 %766  ;;  %v765_v28 = vpop.permute.xlu0 %764 }
 0x171   : > { %v757_v30 = vmul.f32 0.0625, %v755_v1  ;;  %v756_v38 = vmul.f32 0.0625, %v740_v34  ;;  %v829_v9 = vmul.f32 %v2660_v39, %v767_v50  ;;  %v828_v40 = vmul.f32 %v2664_v61, %v765_v28  ;;  %v2694_v34 = vld [vmem:[%s1896_s20 + $0x48] sm:$0xff]  ;;  %v2698_v28 = vld [vmem:[%s1896_s20 + $0x40] sm:$0xff] }
 0x172   : > { %952 = vrot.lane.b32.xlu1 %v3273_v44, %s1757_s8  ;;  %950 = vrot.lane.b32.xlu0 %v3274_v36, %s1757_s8  ;;  %v2707_v44 = vld [vmem:[%s1903_s18 + $0x60] sm:$0xff] }
 0x173   : > { %v760_v37 = vsel %vm758_vm2, %v757_v30, 0.0  ;;  %v759_v24 = vsel %vm758_vm2, %v756_v38, 0.0  ;;  %v2702_v38 = vld [vmem:[%s1903_s18 + $0x68] sm:$0xff] }
 0x174   : > { %1448 = vst [vmem:[%s2217_s28 + $0x38] sm:$0xff] %v760_v37  ;;  %1447 = vst [vmem:[%s2217_s28 + $0x30] sm:$0xff] %v759_v24  ;;  %v771_v55 = vpop.permute.xlu1 %770  ;;  %v769_v2 = vpop.permute.xlu0 %768  ;;  %v2712_v24 = vld [vmem:[%s1896_s20 + $0x58] sm:$0xff] }
 0x175   : > { %v831_v12 = vmul.f32 %v2652_v57, %v771_v55  ;;  %v830_v25 = vmul.f32 %v2656_v56, %v769_v2  ;;  %v2716_v2 = vld [vmem:[%s1896_s20 + $0x50] sm:$0xff] }
 0x176   : > { %956 = vrot.lane.b32.xlu1 %v3275_v13, %s1757_s8  ;;  %954 = vrot.lane.b32.xlu0 %v3276_v43, %s1757_s8 }
 0x177   : > { %v875_v8 = vadd.f32 %v831_v12, %v829_v9  ;;  %v860_v19 = vadd.f32 %v830_v25, %v828_v40 }
 0x178   : > { %v775_v46 = vpop.permute.xlu1 %774  ;;  %v773_v47 = vpop.permute.xlu0 %772 }
 0x179   : > { %v833_v41 = vmul.f32 %v2668_v49, %v775_v46  ;;  %v832_v45 = vmul.f32 %v2672_v27, %v773_v47 }
 0x17a   : > { %960 = vrot.lane.b32.xlu1 %v3277_v51, %s1757_s8  ;;  %958 = vrot.lane.b32.xlu0 %v3278_v52, %s1757_s8  ;;  %v2720_v52 = vld [vmem:[%s1896_s20 + $0x68] sm:$0xff] }
 0x17b   : > { %v876_v23 = vadd.f32 %v875_v8, %v833_v41  ;;  %v861_v1 = vadd.f32 %v860_v19, %v832_v45  ;;  %v2748_v19 = vld [vmem:[%s1896_s20 + $0x88] sm:$0xff] }
 0x17c   : > { %v779_v53 = vpop.permute.xlu1 %778  ;;  %v777_v58 = vpop.permute.xlu0 %776 }
 0x17d   : > { %v835_v17 = vmul.f32 %v2686_v0, %v779_v53  ;;  %v834_v31 = vmul.f32 %v2690_v18, %v777_v58  ;;  %v2724_v58 = vld [vmem:[%s1896_s20 + $0x60] sm:$0xff] }
 0x17e   : > { %1034 = vrot.lane.b32.xlu1 %v2598_v5, %s1758_s15  ;;  %1032 = vrot.lane.b32.xlu0 %v2603_v10, %s1758_s15 }
 0x17f   : > { %v877_v36 = vadd.f32 %v876_v23, %v835_v17  ;;  %v862_v37 = vadd.f32 %v861_v1, %v834_v31  ;;  %v2752_v31 = vld [vmem:[%s1896_s20 + $0x80] sm:$0xff] }
 0x180   : > { %v783_v6 = vpop.permute.xlu1 %782  ;;  %v781_v59 = vpop.permute.xlu0 %780 }
 0x181   : > { %v837_v50 = vmul.f32 %v2694_v34, %v783_v6  ;;  %v836_v30 = vmul.f32 %v2698_v28, %v781_v59  ;;  %v2728_v59 = vld [vmem:[%s1903_s18 + $0x78] sm:$0xff] }
 0x182   : > { %1038 = vrot.lane.b32.xlu1 %v2608_v62, %s1758_s15  ;;  %1036 = vrot.lane.b32.xlu0 %v2613_v54, %s1758_s15 }
 0x183   : > { %v878_v47 = vadd.f32 %v877_v36, %v837_v50  ;;  %v863_v51 = vadd.f32 %v862_v37, %v836_v30  ;;  %v2763_v50 = vld [vmem:[%s1896_s20 + $0x98] sm:$0xff]  ;;  %v2767_v30 = vld [vmem:[%s1896_s20 + $0x90] sm:$0xff] }
 0x184   : > { %v787_v60 = vpop.permute.xlu1 %786  ;;  %v785_v16 = vpop.permute.xlu0 %784 }
 0x185   : > { %v839_v55 = vmul.f32 %v2712_v24, %v787_v60  ;;  %v838_v13 = vmul.f32 %v2716_v2, %v785_v16  ;;  %v2733_v60 = vld [vmem:[%s1903_s18 + $0x70] sm:$0xff] }
 0x186   : > { %1042 = vrot.lane.b32.xlu1 %v2618_v26, %s1758_s15  ;;  %1040 = vrot.lane.b32.xlu0 %v2623_v4, %s1758_s15 }
 0x187   : > { %v879_v16 = vadd.f32 %v878_v47, %v839_v55  ;;  %v864_v12 = vadd.f32 %v863_v51, %v838_v13  ;;  %v2771_v13 = vld [vmem:[%s1896_s20 + $0xa8] sm:$0xff]  ;;  %v2775_v51 = vld [vmem:[%s1896_s20 + $0xa0] sm:$0xff] }
 0x188   : > { %v791_v11 = vpop.permute.xlu1 %790  ;;  %v789_v33 = vpop.permute.xlu0 %788  ;;  %3280 = vst [vmem:[#allocation27_spill] sm:$0xff] %v2775_v51 }
 0x189   : > { %v841_v53 = vmul.f32 %v2720_v52, %v791_v11  ;;  %v840_v6 = vmul.f32 %v2724_v58, %v789_v33  ;;  %v2738_v11 = vld [vmem:[%s1896_s20 + $0x78] sm:$0xff]  ;;  %v2743_v33 = vld [vmem:[%s1896_s20 + $0x70] sm:$0xff] }
 0x18a   : > { %1046 = vrot.lane.b32.xlu1 %v2628_v63, %s1758_s15  ;;  %1044 = vrot.lane.b32.xlu0 %v2633_v32, %s1758_s15 }
 0x18b   : > { %v880_v45 = vadd.f32 %v879_v16, %v841_v53  ;;  %v865_v8 = vadd.f32 %v864_v12, %v840_v6  ;;  %v2783_v6 = vld [vmem:[%s1896_s20 + $0xb8] sm:$0xff]  ;;  %v2787_v12 = vld [vmem:[%s1896_s20 + $0xb0] sm:$0xff] }
 0x18c   : > { %v2637_v48 = vpop.permute.xlu1 %794  ;;  %v2639_v15 = vpop.permute.xlu0 %792  ;;  %3281 = vst [vmem:[#allocation33_spill] sm:$0xff] %v2783_v6  ;;  %3282 = vst [vmem:[#allocation20_spill] sm:$0xff] %v2787_v12 }
 0x18d   : > { %v843_v25 = vmul.f32 %v2738_v11, %v2637_v48  ;;  %v842_v9 = vmul.f32 %v2743_v33, %v2639_v15  ;;  %v2758_v15 = vld [vmem:[%s1903_s18 + $0x80] sm:$0xff] }
 0x18e   : > { %1050 = vrot.lane.b32.xlu1 %v2642_v20, %s1758_s15  ;;  %1048 = vrot.lane.b32.xlu0 %v2647_v14, %s1758_s15 }
 0x18f   : > { %v881_v23 = vadd.f32 %v880_v45, %v843_v25  ;;  %v866_v1 = vadd.f32 %v865_v8, %v842_v9  ;;  %v2795_v8 = vld [vmem:[%s1896_s20 + $0xc0] sm:$0xff] }
 0x190   : > { %v799_v7 = vpop.permute.xlu1 %798  ;;  %v797_v42 = vpop.permute.xlu0 %796  ;;  %3284 = vst [vmem:[#allocation12_spill] sm:$0xff] %v2795_v8 }
 0x191   : > { %v845_v17 = vmul.f32 %v2748_v19, %v799_v7  ;;  %v844_v48 = vmul.f32 %v2752_v31, %v797_v42 }
 0x192   : > { %1054 = vrot.lane.b32.xlu1 %v2676_v3, %s1758_s15  ;;  %1052 = vrot.lane.b32.xlu0 %v2681_v21, %s1758_s15 }
 0x193   : > { %v867_v55 = vadd.f32 %v866_v1, %v844_v48  ;;  %v2803_v48 = vld [vmem:[%s1896_s20 + $0xd8] sm:$0xff]  ;;  %v2807_v1 = vld [vmem:[%s1896_s20 + $0xd0] sm:$0xff] }
 0x194   : > { %v803_v35 = vpop.permute.xlu1 %802  ;;  %v801_v22 = vpop.permute.xlu0 %800  ;;  %3285 = vst [vmem:[#allocation13_spill] sm:$0xff] %v2803_v48  ;;  %3286 = vst [vmem:[#allocation11_spill] sm:$0xff] %v2807_v1 }
 0x195   : > { %v847_v7 = vmul.f32 %v2763_v50, %v803_v35  ;;  %v846_v42 = vmul.f32 %v2767_v30, %v801_v22 }
 0x196   : > { %1058 = vrot.lane.b32.xlu1 %v2702_v38, %s1758_s15  ;;  %1056 = vrot.lane.b32.xlu0 %v2707_v44, %s1758_s15 }
 0x197   : > { %v868_v22 = vadd.f32 %v867_v55, %v846_v42  ;;  %v2815_v55 = vld [vmem:[%s1896_s20 + $0xe0] sm:$0xff] }
 0x198   : > { %v807_v43 = vpop.permute.xlu1 %806  ;;  %v805_v46 = vpop.permute.xlu0 %804  ;;  %3288 = vst [vmem:[#allocation16_spill] sm:$0xff] %v2815_v55 }
 0x199   : > { %v849_v47 = vmul.f32 %v2771_v13, %v807_v43  ;;  %v848_v53 = vmul.f32 %v2775_v51, %v805_v46 }
 0x19a   : > { %1062 = vrot.lane.b32.xlu1 %v2728_v59, %s1758_s15  ;;  %1060 = vrot.lane.b32.xlu0 %v2733_v60, %s1758_s15 }
 0x19b   : > { %v869_v45 = vadd.f32 %v868_v22, %v848_v53 }
 0x19c   : > { %v811_v40 = vpop.permute.xlu1 %810  ;;  %v809_v41 = vpop.permute.xlu0 %808 }
 0x19d   : > { %v851_v16 = vmul.f32 %v2783_v6, %v811_v40  ;;  %v850_v43 = vmul.f32 %v2787_v12, %v809_v41 }
 0x19e   : > { %1166 = vrot.lane.b32.xlu1 %v2603_v10, %s1759_s16  ;;  %1064 = vrot.lane.b32.xlu0 %v2758_v15, %s1758_s15  ;;  %v882_v10 = vadd.f32 %v881_v23, %v845_v17 }
 0x19f   : > { %v870_v41 = vadd.f32 %v869_v45, %v850_v43  ;;  %v2827_v45 = vld [vmem:[%s1896_s20 + $0xf0] sm:$0xff] }
 0x1a0   : > { %v815_v36 = vpop.permute.xlu1 %814  ;;  %v813_v37 = vpop.permute.xlu0 %812  ;;  %v883_v35 = vadd.f32 %v882_v10, %v847_v7  ;;  %3290 = vst [vmem:[#allocation18_spill] sm:$0xff] %v2827_v45 }
 0x1a1   : > { %v852_v17 = vmul.f32 %v2795_v8, %v813_v37 }
 0x1a2   : > { %1170 = vrot.lane.b32.xlu1 %v2613_v54, %s1759_s16  ;;  %1168 = vrot.lane.b32.xlu0 %v2598_v5, %s1759_s16  ;;  %v884_v9 = vadd.f32 %v883_v35, %v849_v47  ;;  %v2791_v54 = vld [vmem:[%s1896_s20 + $0xc8] sm:$0xff] }
 0x1a3   : > { %3283 = vst [vmem:[#allocation14_spill] sm:$0xff] %v2791_v54  ;;  %v853_v5 = vmul.f32 %v2791_v54, %v815_v36  ;;  %v871_v10 = vadd.f32 %v870_v41, %v852_v17 }
 0x1a4   : > { %v819_v25 = vpop.permute.xlu1 %818  ;;  %v817_v46 = vpop.permute.xlu0 %816  ;;  %v885_v40 = vadd.f32 %v884_v9, %v851_v16 }
 0x1a5   : > { %v855_v23 = vmul.f32 %v2803_v48, %v819_v25  ;;  %v854_v7 = vmul.f32 %v2807_v1, %v817_v46  ;;  %v2823_v46 = vld [vmem:[%s1896_s20 + $0xf8] sm:$0xff] }
 0x1a6   : > { %1174 = vrot.lane.b32.xlu1 %v2623_v4, %s1759_s16  ;;  %1172 = vrot.lane.b32.xlu0 %v2608_v62, %s1759_s16  ;;  %v886_v37 = vadd.f32 %v885_v40, %v853_v5  ;;  %v2811_v4 = vld [vmem:[%s1896_s20 + $0xe8] sm:$0xff]  ;;  %3289 = vst [vmem:[#allocation17_spill] sm:$0xff] %v2823_v46  ;;  %s1663_s20 = scalar_lea.vmem %s3020_s4, 2048 }
 0x1a7   : > { %3287 = vst [vmem:[#allocation15_spill] sm:$0xff] %v2811_v4  ;;  %v872_v35 = vadd.f32 %v871_v10, %v854_v7  ;;  %v1592_v10 = vld [vmem:[%s1903_s18 + $0x88] sm:$0xff]  ;;  %p1664_p8 = scmp.ne.s32.totalorder %s3020_s4, %s1663_s20 }
 0x1a8   : > { %v823_v42 = vpop.permute.xlu1 %822  ;;  %v821_v36 = vpop.permute.xlu0 %820  ;;  %v887_v53 = vadd.f32 %v886_v37, %v855_v23 }
 0x1a9   : > { %v857_v62 = vmul.f32 %v2811_v4, %v823_v42  ;;  %v856_v47 = vmul.f32 %v2815_v55, %v821_v36  ;;  %p1665_p0 = pnand %p1664_p8, %p1829_p9 }
 0x1aa   : > { %1178 = vrot.lane.b32.xlu1 %v2633_v32, %s1759_s16  ;;  %1176 = vrot.lane.b32.xlu0 %v2618_v26, %s1759_s16 }
 0x1ab   : > { %v888_v43 = vadd.f32 %v887_v53, %v857_v62  ;;  %v873_v25 = vadd.f32 %v872_v35, %v856_v47  ;;  %v1594_v47 = vld [vmem:[%s1903_s18 + $0x90] sm:$0xff]  ;;  %p1666_p2 = pneg %p1665_p0 }
 0x1ac   : > { %v827_v22 = vpop.permute.xlu1 %826  ;;  %v825_v16 = vpop.permute.xlu0 %824 }
 0x1ad   : > { %v859_v9 = vmul.f32 %v2823_v46, %v827_v22  ;;  %v858_v5 = vmul.f32 %v2827_v45, %v825_v16  ;;  %v1595_v16 = vld [vmem:[%s1903_s18 + $0xa8] sm:$0xff] }
 0x1ae   : > { %1182 = vrot.lane.b32.xlu1 %v2647_v14, %s1759_s16  ;;  %1180 = vrot.lane.b32.xlu0 %v2628_v63, %s1759_s16 }
 0x1af   : > { %v889_v26 = vadd.f32 %v888_v43, %v859_v9  ;;  %v874_v32 = vadd.f32 %v873_v25, %v858_v5 }
 0x1b0   : > { %v901_v17 = vpop.permute.xlu1 %900  ;;  %v899_v40 = vpop.permute.xlu0 %898 }
 0x1b1   : > { %v891_v41 = vmul.f32 0.0625, %v889_v26  ;;  %v890_v23 = vmul.f32 0.0625, %v874_v32  ;;  %v963_v26 = vmul.f32 %v2660_v39, %v901_v17  ;;  %v962_v32 = vmul.f32 %v2664_v61, %v899_v40 }
 0x1b2   : > { %1186 = vrot.lane.b32.xlu1 %v2681_v21, %s1759_s16  ;;  %1184 = vrot.lane.b32.xlu0 %v2642_v20, %s1759_s16 }
 0x1b3   : > { %v894_v7 = vsel %vm892_vm3, %v891_v41, 0.0  ;;  %v893_v14 = vsel %vm892_vm3, %v890_v23, 0.0 }
 0x1b4   : > { %1450 = vst [vmem:[%s2217_s28 + $0x48] sm:$0xff] %v894_v7  ;;  %1449 = vst [vmem:[%s2217_s28 + $0x40] sm:$0xff] %v893_v14  ;;  %v905_v63 = vpop.permute.xlu1 %904  ;;  %v903_v42 = vpop.permute.xlu0 %902 }
 0x1b5   : > { %v965_v43 = vmul.f32 %v2652_v57, %v905_v63  ;;  %v964_v25 = vmul.f32 %v2656_v56, %v903_v42 }
 0x1b6   : > { %1190 = vrot.lane.b32.xlu1 %v2707_v44, %s1759_s16  ;;  %1188 = vrot.lane.b32.xlu0 %v2676_v3, %s1759_s16 }
 0x1b7   : > { %v1009_v7 = vadd.f32 %v965_v43, %v963_v26  ;;  %v994_v14 = vadd.f32 %v964_v25, %v962_v32 }
 0x1b8   : > { %v909_v36 = vpop.permute.xlu1 %908  ;;  %v907_v37 = vpop.permute.xlu0 %906 }
 0x1b9   : > { %v967_v41 = vmul.f32 %v2668_v49, %v909_v36  ;;  %v966_v23 = vmul.f32 %v2672_v27, %v907_v37  ;;  %v1597_v49 = vld [vmem:[%s1903_s18 + $0xb8] sm:$0xff]  ;;  %v1598_v37 = vld [vmem:[%s1903_s18 + $0xb0] sm:$0xff] }
 0x1ba   : > { %1194 = vrot.lane.b32.xlu1 %v2733_v60, %s1759_s16  ;;  %1192 = vrot.lane.b32.xlu0 %v2702_v38, %s1759_s16  ;;  %v1593_v38 = vld [vmem:[%s1903_s18 + $0x98] sm:$0xff] }
 0x1bc   : > { %v913_v20 = vpop.permute.xlu1 %912  ;;  %v911_v21 = vpop.permute.xlu0 %910 }
 0x1bd   : > { %v969_v63 = vmul.f32 %v2686_v0, %v913_v20  ;;  %v968_v42 = vmul.f32 %v2690_v18, %v911_v21 }
 0x1be   : > { %1066 = vrot.lane.b32.xlu1 %v1592_v10, %s1758_s15  ;;  %1196 = vrot.lane.b32.xlu0 %v2728_v59, %s1759_s16 }
 0x1c0   : > { %v917_v44 = vpop.permute.xlu1 %916  ;;  %v915_v3 = vpop.permute.xlu0 %914 }
 0x1c1   : > { %v971_v40 = vmul.f32 %v2694_v34, %v917_v44  ;;  %v970_v36 = vmul.f32 %v2698_v28, %v915_v3 }
 0x1c2   : > { %1200 = vrot.lane.b32.xlu1 %v1592_v10, %s1759_s16  ;;  %1198 = vrot.lane.b32.xlu0 %v2758_v15, %s1759_s16  ;;  %v1596_v15 = vld [vmem:[%s1903_s18 + $0xa0] sm:$0xff] }
 0x1c4   : > { %v921_v60 = vpop.permute.xlu1 %920  ;;  %v919_v62 = vpop.permute.xlu0 %918 }
 0x1c5   : > { %v973_v20 = vmul.f32 %v2712_v24, %v921_v60  ;;  %v972_v21 = vmul.f32 %v2716_v2, %v919_v62 }
 0x1c6   : > { %1070 = vrot.lane.b32.xlu1 %v1593_v38, %s1758_s15  ;;  %1068 = vrot.lane.b32.xlu0 %v1594_v47, %s1758_s15 }
 0x1c8   : > { %v925_v53 = vpop.permute.xlu1 %924  ;;  %v923_v35 = vpop.permute.xlu0 %922 }
 0x1c9   : > { %v975_v44 = vmul.f32 %v2720_v52, %v925_v53  ;;  %v974_v3 = vmul.f32 %v2724_v58, %v923_v35 }
 0x1ca   : > { %1204 = vrot.lane.b32.xlu1 %v1593_v38, %s1759_s16  ;;  %1202 = vrot.lane.b32.xlu0 %v1594_v47, %s1759_s16  ;;  %v1010_v38 = vadd.f32 %v1009_v7, %v967_v41  ;;  %v995_v47 = vadd.f32 %v994_v14, %v966_v23 }
 0x1cc   : > { %v929_v59 = vpop.permute.xlu1 %928  ;;  %v927_v22 = vpop.permute.xlu0 %926 }
 0x1cd   : > { %v977_v60 = vmul.f32 %v2738_v11, %v929_v59  ;;  %v976_v62 = vmul.f32 %v2743_v33, %v927_v22 }
 0x1ce   : > { %1074 = vrot.lane.b32.xlu1 %v1595_v16, %s1758_s15  ;;  %1072 = vrot.lane.b32.xlu0 %v1596_v15, %s1758_s15 }
 0x1d0   : > { %v933_v9 = vpop.permute.xlu1 %932  ;;  %v931_v5 = vpop.permute.xlu0 %930 }
 0x1d1   : > { %v978_v53 = vmul.f32 %v2752_v31, %v931_v5 }
 0x1d2   : > { %1208 = vrot.lane.b32.xlu1 %v1595_v16, %s1759_s16  ;;  %1206 = vrot.lane.b32.xlu0 %v1596_v15, %s1759_s16  ;;  %v1011_v16 = vadd.f32 %v1010_v38, %v969_v63  ;;  %v996_v15 = vadd.f32 %v995_v47, %v968_v42  ;;  %v979_v38 = vmul.f32 %v2748_v19, %v933_v9  ;;  %v1599_v47 = vld [vmem:[%s1903_s18 + $0xc8] sm:$0xff] }
 0x1d4   : > { %v937_v10 = vpop.permute.xlu1 %936  ;;  %v935_v17 = vpop.permute.xlu0 %934  ;;  %v1012_v26 = vadd.f32 %v1011_v16, %v971_v40  ;;  %v997_v32 = vadd.f32 %v996_v15, %v970_v36 }
 0x1d5   : > { %v981_v59 = vmul.f32 %v2763_v50, %v937_v10  ;;  %v980_v22 = vmul.f32 %v2767_v30, %v935_v17 }
 0x1d6   : > { %1078 = vrot.lane.b32.xlu1 %v1597_v49, %s1758_s15  ;;  %1076 = vrot.lane.b32.xlu0 %v1598_v37, %s1758_s15  ;;  %v1013_v41 = vadd.f32 %v1012_v26, %v973_v20  ;;  %v998_v23 = vadd.f32 %v997_v32, %v972_v21 }
 0x1d8   : > { %v941_v43 = vpop.permute.xlu1 %940  ;;  %v939_v25 = vpop.permute.xlu0 %938  ;;  %v1014_v63 = vadd.f32 %v1013_v41, %v975_v44  ;;  %v999_v42 = vadd.f32 %v998_v23, %v974_v3  ;;  %v1601_v23 = vld [vmem:[%s1903_s18 + $0xd8] sm:$0xff] }
 0x1d9   : > { %v983_v9 = vmul.f32 %v2771_v13, %v941_v43  ;;  %v982_v5 = vmul.f32 %v2775_v51, %v939_v25  ;;  %v1602_v25 = vld [vmem:[%s1903_s18 + $0xd0] sm:$0xff] }
 0x1da   : > { %1212 = vrot.lane.b32.xlu1 %v1597_v49, %s1759_s16  ;;  %1210 = vrot.lane.b32.xlu0 %v1598_v37, %s1759_s16  ;;  %v1600_v49 = vld [vmem:[%s1903_s18 + $0xc0] sm:$0xff]  ;;  %v1015_v35 = vadd.f32 %v1014_v63, %v977_v60  ;;  %v1000_v40 = vadd.f32 %v999_v42, %v976_v62 }
 0x1dc   : > { %v945_v7 = vpop.permute.xlu1 %944  ;;  %v943_v14 = vpop.permute.xlu0 %942  ;;  %v1016_v16 = vadd.f32 %v1015_v35, %v979_v38  ;;  %v1001_v15 = vadd.f32 %v1000_v40, %v978_v53 }
 0x1dd   : > { %v985_v10 = vmul.f32 %v2783_v6, %v945_v7  ;;  %v984_v17 = vmul.f32 %v2787_v12, %v943_v14 }
 0x1de   : > { %1082 = vrot.lane.b32.xlu1 %v1599_v47, %s1758_s15  ;;  %1080 = vrot.lane.b32.xlu0 %v1600_v49, %s1758_s15  ;;  %v1017_v20 = vadd.f32 %v1016_v16, %v981_v59  ;;  %v1002_v21 = vadd.f32 %v1001_v15, %v980_v22 }
 0x1e0   : > { %v949_v36 = vpop.permute.xlu1 %948  ;;  %v947_v37 = vpop.permute.xlu0 %946  ;;  %v1018_v44 = vadd.f32 %v1017_v20, %v983_v9  ;;  %v1003_v3 = vadd.f32 %v1002_v21, %v982_v5  ;;  %v1603_v9 = vld [vmem:[%s1903_s18 + $0xe8] sm:$0xff]  ;;  %v1604_v5 = vld [vmem:[%s1903_s18 + $0xe0] sm:$0xff] }
 0x1e1   : > { %v987_v41 = vmul.f32 %v2791_v54, %v949_v36  ;;  %v986_v43 = vmul.f32 %v2795_v8, %v947_v37 }
 0x1e2   : > { %1216 = vrot.lane.b32.xlu1 %v1599_v47, %s1759_s16  ;;  %1214 = vrot.lane.b32.xlu0 %v1600_v49, %s1759_s16  ;;  %v1019_v60 = vadd.f32 %v1018_v44, %v985_v10  ;;  %v1004_v62 = vadd.f32 %v1003_v3, %v984_v17 }
 0x1e4   : > { %v953_v26 = vpop.permute.xlu1 %952  ;;  %v951_v32 = vpop.permute.xlu0 %950  ;;  %v1020_v38 = vadd.f32 %v1019_v60, %v987_v41  ;;  %v1005_v53 = vadd.f32 %v1004_v62, %v986_v43 }
 0x1e5   : > { %v989_v7 = vmul.f32 %v2803_v48, %v953_v26  ;;  %v988_v14 = vmul.f32 %v2807_v1, %v951_v32 }
 0x1e6   : > { %1086 = vrot.lane.b32.xlu1 %v1601_v23, %s1758_s15  ;;  %1084 = vrot.lane.b32.xlu0 %v1602_v25, %s1758_s15 }
 0x1e7   : > { %v1021_v35 = vadd.f32 %v1020_v38, %v989_v7  ;;  %v1006_v40 = vadd.f32 %v1005_v53, %v988_v14  ;;  %v1605_v7 = vld [vmem:[%s1903_s18 + $0xf8] sm:$0xff]  ;;  %v1606_v14 = vld [vmem:[%s1903_s18 + $0xf0] sm:$0xff]  ;;  %s1667_s18 = sshll.u32 %s1760_s5, 4  ;;  %s1668_s18 = int_to_ptr.vmem [resolvable:$false] %s1667_s18 }
 0x1e8   : > { %v957_v63 = vpop.permute.xlu1 %956  ;;  %v955_v42 = vpop.permute.xlu0 %954  ;;  %s1669_s19 = scalar_lea.vmem %s1668_s18, 4096  ;;  %p1670_p5 = scmp.lt.s32.totalorder %s3020_s4, %s1668_s18 }
 0x1e9   : > { %v991_v47 = vmul.f32 %v2811_v4, %v957_v63  ;;  %v990_v49 = vmul.f32 %v2815_v55, %v955_v42  ;;  %p1671_p6 = scmp.lt.s32.totalorder %s1669_s19, %s1663_s20 }
 0x1ea   : > { %1220 = vrot.lane.b32.xlu1 %v1601_v23, %s1759_s16  ;;  %1218 = vrot.lane.b32.xlu0 %v1602_v25, %s1759_s16 }
 0x1eb   : > { %v1022_v36 = vadd.f32 %v1021_v35, %v991_v47  ;;  %v1007_v37 = vadd.f32 %v1006_v40, %v990_v49  ;;  %v3291_v47 = vld [vmem:[#allocation29_spill] sm:$0xff]  ;;  %p1672_p4 = por %p1671_p6, %p1670_p5 }
 0x1ec   : > { %v961_v59 = vpop.permute.xlu1 %960  ;;  %v959_v22 = vpop.permute.xlu0 %958 }
 0x1ed   : > { %v993_v16 = vmul.f32 %v2823_v46, %v961_v59  ;;  %v992_v15 = vmul.f32 %v2827_v45, %v959_v22  ;;  %p1673_p7 = pnand %p1672_p4, %p1666_p2 }
 0x1ee   : > { %1090 = vrot.lane.b32.xlu1 %v1603_v9, %s1758_s15  ;;  %1088 = vrot.lane.b32.xlu0 %v1604_v5, %s1758_s15 }
 0x1ef   : > { %v1023_v20 = vadd.f32 %v1022_v36, %v993_v16  ;;  %v1008_v21 = vadd.f32 %v1007_v37, %v992_v15 }
 0x1f0   : > { %v1035_v10 = vpop.permute.xlu1 %1034  ;;  %v1033_v17 = vpop.permute.xlu0 %1032 }
 0x1f1   : > { %v1025_v26 = vmul.f32 0.0625, %v1023_v20  ;;  %v1024_v32 = vmul.f32 0.0625, %v1008_v21  ;;  %v1097_v23 = vmul.f32 %v2660_v39, %v1035_v10  ;;  %v1096_v25 = vmul.f32 %v2664_v61, %v1033_v17 }
 0x1f2   : > { %1224 = vrot.lane.b32.xlu1 %v1603_v9, %s1759_s16  ;;  %1222 = vrot.lane.b32.xlu0 %v1604_v5, %s1759_s16 }
 0x1f3   : > { %v1028_v44 = vsel %vm1026_vm4, %v1025_v26, 0.0  ;;  %v1027_v3 = vsel %vm1026_vm4, %v1024_v32, 0.0 }
 0x1f4   : > { %1452 = vst [vmem:[%s2217_s28 + $0x58] sm:$0xff] %v1028_v44  ;;  %1451 = vst [vmem:[%s2217_s28 + $0x50] sm:$0xff] %v1027_v3  ;;  %v1039_v41 = vpop.permute.xlu1 %1038  ;;  %v1037_v43 = vpop.permute.xlu0 %1036 }
 0x1f5   : > { %v1099_v60 = vmul.f32 %v2652_v57, %v1039_v41  ;;  %v1098_v62 = vmul.f32 %v2656_v56, %v1037_v43 }
 0x1f6   : > { %1094 = vrot.lane.b32.xlu1 %v1605_v7, %s1758_s15  ;;  %1092 = vrot.lane.b32.xlu0 %v1606_v14, %s1758_s15 }
 0x1f7   : > { %v1143_v63 = vadd.f32 %v1099_v60, %v1097_v23  ;;  %v1128_v42 = vadd.f32 %v1098_v62, %v1096_v25 }
 0x1f8   : > { %v1043_v38 = vpop.permute.xlu1 %1042  ;;  %v1041_v53 = vpop.permute.xlu0 %1040 }
 0x1f9   : > { %v1101_v49 = vmul.f32 %v3291_v47, %v1043_v38  ;;  %v1100_v35 = vmul.f32 %v2672_v27, %v1041_v53 }
 0x1fa   : > { %1228 = vrot.lane.b32.xlu1 %v1605_v7, %s1759_s16  ;;  %1226 = vrot.lane.b32.xlu0 %v1606_v14, %s1759_s16 }
 0x1fb   : > { %v1144_v40 = vadd.f32 %v1143_v63, %v1101_v49  ;;  %v1129_v59 = vadd.f32 %v1128_v42, %v1100_v35 }
 0x1fc   : > { %v1047_v22 = vpop.permute.xlu1 %1046  ;;  %v1045_v36 = vpop.permute.xlu0 %1044 }
 0x1fd   : > { %v1103_v37 = vmul.f32 %v2686_v0, %v1047_v22  ;;  %v1102_v16 = vmul.f32 %v2690_v18, %v1045_v36 }
 0x1ff   : > { %v1145_v15 = vadd.f32 %v1144_v40, %v1103_v37  ;;  %v1130_v9 = vadd.f32 %v1129_v59, %v1102_v16 }
 0x200   : > { %v1051_v5 = vpop.permute.xlu1 %1050  ;;  %v1049_v20 = vpop.permute.xlu0 %1048 }
 0x201   : > { %v1105_v21 = vmul.f32 %v2694_v34, %v1051_v5  ;;  %v1104_v10 = vmul.f32 %v2698_v28, %v1049_v20 }
 0x203   : > { %v1146_v17 = vadd.f32 %v1145_v15, %v1105_v21  ;;  %v1131_v26 = vadd.f32 %v1130_v9, %v1104_v10 }
 0x204   : > { %v1055_v32 = vpop.permute.xlu1 %1054  ;;  %v1053_v44 = vpop.permute.xlu0 %1052 }
 0x205   : > { %v1107_v3 = vmul.f32 %v2712_v24, %v1055_v32  ;;  %v1106_v41 = vmul.f32 %v2716_v2, %v1053_v44 }
 0x207   : > { %v1147_v43 = vadd.f32 %v1146_v17, %v1107_v3  ;;  %v1132_v23 = vadd.f32 %v1131_v26, %v1106_v41 }
 0x208   : > { %v1059_v25 = vpop.permute.xlu1 %1058  ;;  %v1057_v60 = vpop.permute.xlu0 %1056 }
 0x209   : > { %v1109_v62 = vmul.f32 %v2720_v52, %v1059_v25  ;;  %v1108_v7 = vmul.f32 %v2724_v58, %v1057_v60 }
 0x20b   : > { %v1148_v14 = vadd.f32 %v1147_v43, %v1109_v62  ;;  %v1133_v63 = vadd.f32 %v1132_v23, %v1108_v7 }
 0x20c   : > { %v1063_v42 = vpop.permute.xlu1 %1062  ;;  %v1061_v38 = vpop.permute.xlu0 %1060 }
 0x20d   : > { %v1111_v53 = vmul.f32 %v2738_v11, %v1063_v42  ;;  %v1110_v49 = vmul.f32 %v2743_v33, %v1061_v38 }
 0x20f   : > { %v2949_v35 = vadd.f32 %v1148_v14, %v1111_v53  ;;  %v1134_v40 = vadd.f32 %v1133_v63, %v1110_v49 }
 0x210   : > { %v1167_v59 = vpop.permute.xlu1 %1166  ;;  %v1065_v22 = vpop.permute.xlu0 %1064 }
 0x211   : > { %v1112_v36 = vmul.f32 %v2752_v31, %v1065_v22  ;;  %v1230_v4 = vmul.f32 %v2664_v61, %v1167_v59 }
 0x213   : > { %v2952_v37 = vadd.f32 %v1134_v40, %v1112_v36 }
 0x214   : > { %v1171_v16 = vpop.permute.xlu1 %1170  ;;  %v1169_v15 = vpop.permute.xlu0 %1168 }
 0x215   : > { %3292 = vst [vmem:[#allocation23_spill] sm:$0xff] %v2952_v37  ;;  %v1232_v46 = vmul.f32 %v2656_v56, %v1171_v16  ;;  %v1231_v1 = vmul.f32 %v2660_v39, %v1169_v15 }
 0x217   : > { %v1262_v6 = vadd.f32 %v1232_v46, %v1230_v4 }
 0x218   : > { %v1175_v9 = vpop.permute.xlu1 %1174  ;;  %v1173_v5 = vpop.permute.xlu0 %1172 }
 0x219   : > { %v1233_v55 = vmul.f32 %v2652_v57, %v1173_v5  ;;  %v1234_v48 = vmul.f32 %v2672_v27, %v1175_v9 }
 0x21b   : > { %v1277_v37 = vadd.f32 %v1233_v55, %v1231_v1  ;;  %v1263_v51 = vadd.f32 %v1262_v6, %v1234_v48 }
 0x21c   : > { %v1179_v20 = vpop.permute.xlu1 %1178  ;;  %v1177_v21 = vpop.permute.xlu0 %1176 }
 0x21d   : > { %v1235_v8 = vmul.f32 %v3291_v47, %v1177_v21 }
 0x21f   : > { %v1278_v56 = vadd.f32 %v1277_v37, %v1235_v8 }
 0x220   : > { %v1183_v10 = vpop.permute.xlu1 %1182  ;;  %v1181_v17 = vpop.permute.xlu0 %1180 }
 0x221   : > { %v1238_v57 = vmul.f32 %v2698_v28, %v1183_v10 }
 0x224   : > { %v1187_v26 = vpop.permute.xlu1 %1186  ;;  %v1185_v32 = vpop.permute.xlu0 %1184 }
 0x225   : > { %v1239_v61 = vmul.f32 %v2694_v34, %v1185_v32  ;;  %v1240_v47 = vmul.f32 %v2716_v2, %v1187_v26  ;;  %v3296_v32 = vld [vmem:[#allocation23_spill] sm:$0xff] }
 0x228   : > { %v1191_v44 = vpop.permute.xlu1 %1190  ;;  %v1189_v3 = vpop.permute.xlu0 %1188 }
 0x229   : > { %v1241_v15 = vmul.f32 %v2712_v24, %v1189_v3 }
 0x22c   : > { %v1195_v41 = vpop.permute.xlu1 %1194  ;;  %v1193_v43 = vpop.permute.xlu0 %1192 }
 0x22d   : > { %v1244_v55 = vmul.f32 %v2743_v33, %v1195_v41 }
 0x230   : > { %v1067_v23 = vpop.permute.xlu1 %1066  ;;  %v1197_v25 = vpop.permute.xlu0 %1196 }
 0x231   : > { %v1113_v28 = vmul.f32 %v2748_v19, %v1067_v23 }
 0x233   : > { %v1150_v9 = vadd.f32 %v2949_v35, %v1113_v28  ;;  %v3305_v28 = vld [vmem:[#allocation15_spill] sm:$0xff] }
 0x234   : > { %v1201_v60 = vpop.permute.xlu1 %1200  ;;  %v1199_v62 = vpop.permute.xlu0 %1198 }
 0x238   : > { %v1071_v7 = vpop.permute.xlu1 %1070  ;;  %v1069_v14 = vpop.permute.xlu0 %1068 }
 0x239   : > { %v1115_v2 = vmul.f32 %v2763_v50, %v1071_v7  ;;  %v1114_v24 = vmul.f32 %v2767_v30, %v1069_v14 }
 0x23b   : > { %v1151_v26 = vadd.f32 %v1150_v9, %v1115_v2 }
 0x23c   : > { %v1205_v63 = vpop.permute.xlu1 %1204  ;;  %v1203_v42 = vpop.permute.xlu0 %1202 }
 0x23d   : > { %v1249_v10 = vmul.f32 %v2763_v50, %v1205_v63  ;;  %v3299_v50 = vld [vmem:[#allocation14_spill] sm:$0xff] }
 0x240   : > { %v1075_v38 = vpop.permute.xlu1 %1074  ;;  %v1073_v53 = vpop.permute.xlu0 %1072 }
 0x241   : > { %v1117_v5 = vmul.f32 %v2771_v13, %v1075_v38 }
 0x243   : > { %v1152_v7 = vadd.f32 %v1151_v26, %v1117_v5 }
 0x244   : > { %v1209_v49 = vpop.permute.xlu1 %1208  ;;  %v1207_v40 = vpop.permute.xlu0 %1206 }
 0x245   : > { %v1251_v35 = vmul.f32 %v2771_v13, %v1209_v49  ;;  %v3303_v49 = vld [vmem:[#allocation13_spill] sm:$0xff] }
 0x248   : > { %v1079_v22 = vpop.permute.xlu1 %1078  ;;  %v1077_v36 = vpop.permute.xlu0 %1076 }
 0x24c   : > { %v2954_v29 = vpop.permute.xlu1 %1212  ;;  %v2956_v45 = vpop.permute.xlu0 %1210 }
 0x24d   : > { %3293 = vst [vmem:[#allocation21_spill] sm:$0xff] %v2954_v29  ;;  %3294 = vst [vmem:[#allocation19_spill] sm:$0xff] %v2956_v45  ;;  %v1236_v29 = vmul.f32 %v2690_v18, %v1179_v20  ;;  %v1237_v45 = vmul.f32 %v2686_v0, %v1181_v17  ;;  %v1242_v18 = vmul.f32 %v2724_v58, %v1191_v44  ;;  %v3295_v20 = vld [vmem:[#allocation27_spill] sm:$0xff] }
 0x24e   : > { %v1243_v0 = vmul.f32 %v2720_v52, %v1193_v43  ;;  %v1247_v58 = vmul.f32 %v2748_v19, %v1201_v60  ;;  %v1246_v52 = vmul.f32 %v2752_v31, %v1199_v62  ;;  %v1116_v33 = vmul.f32 %v3295_v20, %v1073_v53  ;;  %v3297_v19 = vld [vmem:[#allocation33_spill] sm:$0xff]  ;;  %v3298_v31 = vld [vmem:[#allocation20_spill] sm:$0xff] }
 0x24f   : > { %v1264_v16 = vadd.f32 %v1263_v51, %v1236_v29  ;;  %v1279_v27 = vadd.f32 %v1278_v56, %v1237_v45  ;;  %v1245_v29 = vmul.f32 %v2738_v11, %v1197_v25  ;;  %v1248_v17 = vmul.f32 %v2767_v30, %v1203_v42  ;;  %v3300_v30 = vld [vmem:[#allocation12_spill] sm:$0xff] }
 0x250   : > { %v1083_v54 = vpop.permute.xlu1 %1082  ;;  %v1081_v12 = vpop.permute.xlu0 %1080  ;;  %v1136_v44 = vadd.f32 %v3296_v32, %v1114_v24  ;;  %v1119_v3 = vmul.f32 %v3297_v19, %v1079_v22  ;;  %v1118_v41 = vmul.f32 %v3298_v31, %v1077_v36  ;;  %v1250_v25 = vmul.f32 %v3295_v20, %v1207_v40 }
 0x251   : > { %v1265_v4 = vadd.f32 %v1264_v16, %v1238_v57  ;;  %v1280_v1 = vadd.f32 %v1279_v27, %v1239_v61  ;;  %v1121_v63 = vmul.f32 %v3299_v50, %v1083_v54  ;;  %v1120_v42 = vmul.f32 %v3300_v30, %v1081_v12  ;;  %v3304_v16 = vld [vmem:[#allocation11_spill] sm:$0xff] }
 0x252   : > { %v1137_v14 = vadd.f32 %v1136_v44, %v1116_v33  ;;  %v1153_v61 = vadd.f32 %v1152_v7, %v1119_v3  ;;  %v3307_v33 = vld [vmem:[#allocation17_spill] sm:$0xff] }
 0x253   : > { %v1266_v48 = vadd.f32 %v1265_v4, %v1240_v47  ;;  %v1281_v34 = vadd.f32 %v1280_v1, %v1241_v15 }
 0x254   : > { %v1217_v59 = vpop.permute.xlu1 %1216  ;;  %v1215_v39 = vpop.permute.xlu0 %1214  ;;  %v3301_v56 = vld [vmem:[#allocation21_spill] sm:$0xff]  ;;  %v3302_v36 = vld [vmem:[#allocation19_spill] sm:$0xff]  ;;  %v1138_v13 = vadd.f32 %v1137_v14, %v1118_v41 }
 0x255   : > { %v1267_v51 = vadd.f32 %v1266_v48, %v1242_v18  ;;  %v1282_v46 = vadd.f32 %v1281_v34, %v1243_v0  ;;  %v1253_v22 = vmul.f32 %v3297_v19, %v3301_v56  ;;  %v1252_v57 = vmul.f32 %v3298_v31, %v3302_v36  ;;  %v3306_v34 = vld [vmem:[#allocation16_spill] sm:$0xff]  ;;  %v3309_v19 = vld [vmem:[#allocation25_spill] sm:$0xff] }
 0x256   : > { %v1255_v54 = vmul.f32 %v3299_v50, %v1217_v59  ;;  %v1254_v12 = vmul.f32 %v3300_v30, %v1215_v39  ;;  %v1154_v18 = vadd.f32 %v1153_v61, %v1121_v63  ;;  %v1139_v0 = vadd.f32 %v1138_v13, %v1120_v42 }
 0x257   : > { %v1268_v21 = vadd.f32 %v1267_v51, %v1244_v55  ;;  %v1283_v11 = vadd.f32 %v1282_v46, %v1245_v29  ;;  %vm1160_vm5 = vcmp.ge.s32.totalorder %v3309_v19, 6  ;;  %vm1294_vm6 = vcmp.ge.s32.totalorder %v3309_v19, 7 }
 0x258   : > { %v1087_v6 = vpop.permute.xlu1 %1086  ;;  %v1085_v8 = vpop.permute.xlu0 %1084 }
 0x259   : > { %v1284_v43 = vadd.f32 %v1283_v11, %v1247_v58  ;;  %v1269_v23 = vadd.f32 %v1268_v21, %v1246_v52  ;;  %v1123_v40 = vmul.f32 %v3303_v49, %v1087_v6  ;;  %v1122_v27 = vmul.f32 %v3304_v16, %v1085_v8  ;;  %v3308_v11 = vld [vmem:[#allocation18_spill] sm:$0xff] }
 0x25b   : > { %v1285_v38 = vadd.f32 %v1284_v43, %v1249_v10  ;;  %v1270_v53 = vadd.f32 %v1269_v23, %v1248_v17  ;;  %v1155_v24 = vadd.f32 %v1154_v18, %v1123_v40  ;;  %v1140_v51 = vadd.f32 %v1139_v0, %v1122_v27 }
 0x25c   : > { %v1221_v45 = vpop.permute.xlu1 %1220  ;;  %v1219_v37 = vpop.permute.xlu0 %1218 }
 0x25d   : > { %v1286_v47 = vadd.f32 %v1285_v38, %v1251_v35  ;;  %v1271_v15 = vadd.f32 %v1270_v53, %v1250_v25  ;;  %v1257_v6 = vmul.f32 %v3303_v49, %v1221_v45  ;;  %v1256_v8 = vmul.f32 %v3304_v16, %v1219_v37 }
 0x25f   : > { %v1287_v29 = vadd.f32 %v1286_v47, %v1253_v22  ;;  %v1272_v2 = vadd.f32 %v1271_v15, %v1252_v57 }
 0x260   : > { %v1091_v60 = vpop.permute.xlu1 %1090  ;;  %v1089_v62 = vpop.permute.xlu0 %1088 }
 0x261   : > { %v1125_v48 = vmul.f32 %v3305_v28, %v1091_v60  ;;  %v1124_v55 = vmul.f32 %v3306_v34, %v1089_v62  ;;  %v1288_v46 = vadd.f32 %v1287_v29, %v1255_v54  ;;  %v1273_v59 = vadd.f32 %v1272_v2, %v1254_v12 }
 0x263   : > { %v1156_v5 = vadd.f32 %v1155_v24, %v1125_v48  ;;  %v1141_v20 = vadd.f32 %v1140_v51, %v1124_v55  ;;  %v1289_v10 = vadd.f32 %v1288_v46, %v1257_v6  ;;  %v1274_v37 = vadd.f32 %v1273_v59, %v1256_v8 }
 0x264   : > { %v1225_v4 = vpop.permute.xlu1 %1224  ;;  %v1223_v1 = vpop.permute.xlu0 %1222 }
 0x265   : > { %v1259_v39 = vmul.f32 %v3305_v28, %v1225_v4  ;;  %v1258_v58 = vmul.f32 %v3306_v34, %v1223_v1 }
 0x267   : > { %v1290_v32 = vadd.f32 %v1289_v10, %v1259_v39  ;;  %v1275_v44 = vadd.f32 %v1274_v37, %v1258_v58 }
 0x268   : > { %v1095_v52 = vpop.permute.xlu1 %1094  ;;  %v1093_v9 = vpop.permute.xlu0 %1092 }
 0x269   : > { %v1127_v21 = vmul.f32 %v3307_v33, %v1095_v52  ;;  %v1126_v45 = vmul.f32 %v3308_v11, %v1093_v9 }
 0x26b   : > { %v1157_v17 = vadd.f32 %v1156_v5, %v1127_v21  ;;  %v1142_v26 = vadd.f32 %v1141_v20, %v1126_v45 }
 0x26c   : > { %v1229_v3 = vpop.permute.xlu1 %1228  ;;  %v1227_v31 = vpop.permute.xlu0 %1226 }
 0x26d   : > { %v1159_v41 = vmul.f32 0.0625, %v1157_v17  ;;  %v1158_v43 = vmul.f32 0.0625, %v1142_v26  ;;  %v1261_v23 = vmul.f32 %v3307_v33, %v1229_v3  ;;  %v1260_v35 = vmul.f32 %v3308_v11, %v1227_v31 }
 0x26f   : > { %v1162_v25 = vsel %vm1160_vm5, %v1159_v41, 0.0  ;;  %v1161_v60 = vsel %vm1160_vm5, %v1158_v43, 0.0  ;;  %v1291_v62 = vadd.f32 %v1290_v32, %v1261_v23  ;;  %v1276_v7 = vadd.f32 %v1275_v44, %v1260_v35 }
 0x270   : > { %1454 = vst [vmem:[%s2217_s28 + $0x68] sm:$0xff] %v1162_v25  ;;  %1453 = vst [vmem:[%s2217_s28 + $0x60] sm:$0xff] %v1161_v60 }
 0x271   : > { %v1293_v14 = vmul.f32 0.0625, %v1291_v62  ;;  %v1292_v50 = vmul.f32 0.0625, %v1276_v7 }
 0x273   : > { %v1296_v63 = vsel %vm1294_vm6, %v1293_v14, 0.0  ;;  %v1295_v30 = vsel %vm1294_vm6, %v1292_v50, 0.0 }
 0x274   : > { %1456 = vst [vmem:[%s2217_s28 + $0x78] sm:$0xff] %v1296_v63  ;;  %1455 = vst [vmem:[%s2217_s28 + $0x70] sm:$0xff] %v1295_v30 }
 0x275   : > { %1676 = shalt.err (!%p1673_p7)
}
 0x276   : > { %s1677_s21 = scalar_lea.hbm %s3018_s6, 2048  ;;  %s1681_s3 = scalar_lea.hbm %s3072_s2, 4096 }
 0x277   : > { %p1678_p10 = scmp.ne.s32.totalorder %s3018_s6, %s1677_s21  ;;  %p1682_p3 = scmp.lt.s32.totalorder %s3018_s6, %s3072_s2 }
 0x278   : > { %p1683_p8 = scmp.lt.s32.totalorder %s1681_s3, %s1677_s21 }
 0x279   : > { %p1679_p1 = pnand %p1678_p10, %p1829_p9 }
 0x27a   : > { %p1684_p0 = por %p1683_p8, %p1682_p3 }
 0x27b   : > { %p1680_p13 = pneg %p1679_p1 }
 0x27d   : > { %p1685_p2 = pnand %p1684_p0, %p1680_p13 }
 0x27f   : > { %1688 = shalt.err (!%p1685_p2)
}
 0x280   : > { %s1761_s15 = smov 128   ;;  %s1762_s16 = smov 8  }
 0x281   : > { %1469 = dma.vmem_to_hbm [thread:$0]  (%p1829_p9), %s3020_s4, 2048, %s3018_s6, %s1301_s12, %s1761_s15, %s1761_s15, %s1762_s16  }
 0x282 PF: > { %s1331_s30 = sand.u32 1, %s1727_s9   ;;  %p1479_p5 = pnand %p1432_p12, %p1836_p11 }
 0x283   : > { %s1332_s27 = scalar_lea.sflag [#allocation4], %s1331_s30 }
 0x284   : > { %p1480_p6 = pneg %p1479_p5 }
 0x286   : > { %1722 = dma.done.wait (%p1480_p6), %s1332_s27, 2048  }
 0x287   : > { %1724 = vsyncadd (%p1480_p6), %s1332_s27, 4294965248  ;;  %s21_s14 = sadd.s32 1, %s1747_s14   ;;  %s3310_s9 = smov %s1731_s10 }
 0x288   : > { %p18_p4 = scmp.ge.s32.totalorder %s21_s14, 4   ;;  %s3311_s10 = smov %s1735_s11 }
 0x289   : > { %s3312_s11 = smov %s1834_s23  ;;  %s3313_s12 = smov %s1743_s13 }
 0x28a   : > { %s3314_s13 = smov %s3316_s17  ;;  %20 = sbr.rel (!%p18_p4) target bundleno = 8 (0x8), region = 93 }
 0x28f   :  { %1337 = vsyncpa [#allocation3], 1 }
 0x290   :  { %1339 = vsyncpa [#allocation3 + $0x1], 1 }
 0x291   :  { %1340 = vsyncpa [#allocation6], 1 }
 0x292   :  { %1342 = vsyncpa [#allocation6 + $0x1], 1 }
 0x293   :  { %1343 = vsyncpa [#allocation4], 1 }
 0x294   :  { %1345 = vsyncpa [#allocation4 + $0x1], 1 }

</bundles_post_ra>
